<compile_context>
chip_gen: v6e
topology: v6e:2x2x1
jax: 0.10.0
libtpu: 0.0.40
codegen_flags: <defaults>
</compile_context>

<pallas_src>
import functools
import math

import jax
import jax.numpy as jnp
from jax import lax
from jax.experimental import pallas as pl
from jax.experimental.pallas import tpu as pltpu


# ----------------------------------------------------------------------------
# Fused Pallas kernel: all layers, both directions, full sequence, one call.
#   refs = [x2d, (Wih_cat, b_cat, Whh_blk) * n_layers, out, xp_scratch]
#   x2d:     (T*B, In0)      time-major, batch padded to 8 sublanes
#   Wih_cat: (In_l, D*4H)    gate-stacked, direction-stacked input weights
#   b_cat:   (1,   D*4H)     b_ih + b_hh folded
#   Whh_blk: (D*H, D*4H)     block-diagonal gate-stacked recurrent weights
#   out:     (T*B, D*H)
#   xp_scr:  (T*B, D*4H)     VMEM scratch holding the hoisted projection
# ----------------------------------------------------------------------------
def _fused_lstm_decoder_kernel(*refs, T, B, H, n_layers, D):
    n_w = 3 * n_layers
    x_ref = refs[0]
    w_refs = refs[1:1 + n_w]
    out_ref = refs[1 + n_w]
    xp_ref = refs[2 + n_w]          # VMEM scratch for hoisted input projection

    G = 4 * H                        # gates per direction (lane-dense: 128)
    DH = D * H

    # Layer input as a value; layer 0 reads the real input.
    x_val = x_ref[...].astype(jnp.float32)            # (T*B, In0)

    for l in range(n_layers):
        wih = w_refs[3 * l][...]                       # (In_l, D*4H)
        bias = w_refs[3 * l + 1][...]                  # (1,    D*4H)
        whh_blk = w_refs[3 * l + 2][...]               # (D*H,  D*4H) block-diag

        # Hoisted input projection: ONE lane-dense GEMM covering every timestep
        # and both directions, bias folded once.  Staged to VMEM so its live
        # range does not span the unrolled recurrence.
        xp_ref[...] = (jnp.dot(x_val, wih, preferred_element_type=jnp.float32)
                       + bias)

        # Fused state for both directions: [h_fwd | h_bwd], [c_fwd | c_bwd].
        h_cat = jnp.zeros((B, DH), jnp.float32)
        c_cat = jnp.zeros((B, DH), jnp.float32)

        hs = [[None] * T for _ in range(D)]            # per-direction outputs

        for t in range(T):                             # unrolled recurrence
            # Forward consumes timestep t; backward consumes T-1-t.
            if D == 2:
                xp_t = jnp.concatenate(
                    [xp_ref[t * B:(t + 1) * B, 0:G],
                     xp_ref[(T - 1 - t) * B:(T - t) * B, G:2 * G]],
                    axis=1)                            # (B, 2*4H)
            else:
                xp_t = xp_ref[t * B:(t + 1) * B, :]    # (B, 4H)

            # One fused MXU push for both directions (block-diag W_hh).
            gates = xp_t + jnp.dot(h_cat, whh_blk,
                                   preferred_element_type=jnp.float32)

            # EUP: sigmoid once on the full gates vreg(s); tanh only on g / c.
            sg = jax.nn.sigmoid(gates)                 # (B, D*4H)
            i_cat = jnp.concatenate(
                [sg[:, d * G + 0 * H:d * G + 1 * H] for d in range(D)], axis=1)
            f_cat = jnp.concatenate(
                [sg[:, d * G + 1 * H:d * G + 2 * H] for d in range(D)], axis=1)
            o_cat = jnp.concatenate(
                [sg[:, d * G + 3 * H:d * G + 4 * H] for d in range(D)], axis=1)
            g_cat = jnp.tanh(jnp.concatenate(
                [gates[:, d * G + 2 * H:d * G + 3 * H] for d in range(D)],
                axis=1))

            c_cat = f_cat * c_cat + i_cat * g_cat
            h_cat = o_cat * jnp.tanh(c_cat)

            for d in range(D):
                ts = t if d == 0 else T - 1 - t
                hs[d][ts] = h_cat[:, d * H:(d + 1) * H]

        # Assemble the layer output (time-major rows, direction bands per row)
        # entirely from register values: no per-timestep masked band stores.
        x_val = jnp.concatenate(
            [jnp.concatenate([hs[d][t] for d in range(D)], axis=1)
             for t in range(T)],
            axis=0)                                    # (T*B, D*H)

    out_ref[...] = x_val.astype(out_ref.dtype)         # single store


# ----------------------------------------------------------------------------
# Wrapper reproducing LSTM_decoder.forward (multi-layer, optional bidir).
# ----------------------------------------------------------------------------
def lstm_decoder_forward(encoder_outputs, params, n_layers, bid):
    """encoder_outputs: (B, T, 2*hidden_dim) batch_first, like PyTorch."""
    B, T, F0 = encoder_outputs.shape
    D = 2 if bid else 1
    H = params[0][2][0].shape[0]              # Whh is (H, 4H)

    # Pad batch to the 8-sublane granule so per-step slices/stores are aligned.
    B_pad = max(8, ((B + 7) // 8) * 8)

    x_tbf = jnp.transpose(encoder_outputs, (1, 0, 2)).astype(jnp.float32)
    if B_pad != B:
        x_tbf = jnp.pad(x_tbf, ((0, 0), (0, B_pad - B), (0, 0)))
    x2d = x_tbf.reshape(T * B_pad, F0)        # time-major, flattened

    flat_args = [x2d]
    for l in range(n_layers):
        wih_cat, b_cat, whhs = params[l]
        # Block-diagonal recurrent weight so both directions share one matmul.
        whh_blk = jnp.zeros((D * H, D * 4 * H), jnp.float32)
        for d in range(D):
            whh_blk = whh_blk.at[d * H:(d + 1) * H,
                                 d * 4 * H:(d + 1) * 4 * H].set(whhs[d])
        flat_args += [wih_cat, b_cat, whh_blk]

    kernel = functools.partial(_fused_lstm_decoder_kernel,
                               T=T, B=B_pad, H=H, n_layers=n_layers, D=D)

    out2d = pl.pallas_call(
        kernel,
        out_shape=jax.ShapeDtypeStruct((T * B_pad, D * H), jnp.float32),
        in_specs=[pl.BlockSpec(memory_space=pltpu.MemorySpace.VMEM)
                  for _ in flat_args],
        out_specs=pl.BlockSpec(memory_space=pltpu.MemorySpace.VMEM),
        scratch_shapes=[pltpu.VMEM((T * B_pad, D * 4 * H), jnp.float32)],
        compiler_params=pltpu.CompilerParams(
            vmem_limit_bytes=32 * 1024 * 1024),
    )(*flat_args)

    out = out2d.reshape(T, B_pad, D * H)[:, :B, :]
    return jnp.transpose(out, (1, 0, 2)).astype(encoder_outputs.dtype)


# ----------------------------------------------------------------------------
# Pure-JAX reference (lax.scan) for correctness checking.
# ----------------------------------------------------------------------------
def _ref_lstm_dir(x_tbf, wih, whh, bias):
    T_, B_, _ = x_tbf.shape
    H = whh.shape[0]

    def step(carry, x_t):
        h, c = carry
        g = x_t @ wih + h @ whh + bias
        i = jax.nn.sigmoid(g[:, 0:H])
        f = jax.nn.sigmoid(g[:, H:2 * H])
        gg = jnp.tanh(g[:, 2 * H:3 * H])
        o = jax.nn.sigmoid(g[:, 3 * H:4 * H])
        c = f * c + i * gg
        h = o * jnp.tanh(c)
        return (h, c), h

    init = (jnp.zeros((B_, H), jnp.float32), jnp.zeros((B_, H), jnp.float32))
    _, hs = lax.scan(step, init, x_tbf)
    return hs


def _ref_decoder(encoder_outputs, params, n_layers, bid):
    D = 2 if bid else 1
    x = jnp.transpose(encoder_outputs, (1, 0, 2))           # (T, B, F)
    for l in range(n_layers):
        wih_cat, b_cat, whhs = params[l]
        H = whhs[0].shape[0]
        outs = []
        for d in range(D):
            wih = wih_cat[:, d * 4 * H:(d + 1) * 4 * H]
            b = b_cat[:, d * 4 * H:(d + 1) * 4 * H]
            xin = x if d == 0 else x[::-1]
            hs = _ref_lstm_dir(xin, wih, whhs[d], b)
            if d == 1:
                hs = hs[::-1]
            outs.append(hs)
        x = jnp.concatenate(outs, axis=-1)
    return jnp.transpose(x, (1, 0, 2))


# ----------------------------------------------------------------------------
# Deterministic parameter init (PyTorch-style U(-1/sqrt(H), 1/sqrt(H))),
# stored gate-stacked + direction-stacked with bias folded.
# ----------------------------------------------------------------------------
def init_params(key, input_dim, hidden_dim, n_layers, bid):
    H = input_dim // 2
    D = 2 if bid else 1
    bound = 1.0 / math.sqrt(H)
    params = []
    for l in range(n_layers):
        in_feats = 2 * hidden_dim if l == 0 else D * H
        key, kw, kb1, kb2, *khs = jax.random.split(key, 4 + D)
        wih_cat = jax.random.uniform(kw, (in_feats, D * 4 * H), jnp.float32,
                                     -bound, bound)
        b_cat = (jax.random.uniform(kb1, (1, D * 4 * H), jnp.float32,
                                    -bound, bound)
                 + jax.random.uniform(kb2, (1, D * 4 * H), jnp.float32,
                                      -bound, bound))
        whhs = tuple(jax.random.uniform(kh, (H, 4 * H), jnp.float32,
                                        -bound, bound) for kh in khs)
        params.append((wih_cat, b_cat, whhs))
    return params


if __name__ == "__main__":
    # Module config: LSTM_decoder(input_dim=64, hidden_dim=32, n_layers=2,
    #                             dropout=0.0, bid=True, device=...)
    input_dim, hidden_dim, n_layers, bid = 64, 32, 2, True
    batch, seq = 2, 8

    key = jax.random.PRNGKey(0)
    key, kx = jax.random.split(key)
    # encoder_outputs: (batch, seq, 2*hidden_dim), batch_first like PyTorch.
    encoder_outputs = jax.random.normal(kx, (batch, seq, 2 * hidden_dim),
                                        jnp.float32)
    params = init_params(key, input_dim, hidden_dim, n_layers, bid)

    run = jax.jit(functools.partial(lstm_decoder_forward,
                                    n_layers=n_layers, bid=bid))
    out = jax.block_until_ready(run(encoder_outputs, params))

    expected_shape = (batch, seq, (2 if bid else 1) * (input_dim // 2))
    assert out.shape == expected_shape, (out.shape, expected_shape)

    ref = _ref_decoder(encoder_outputs, params, n_layers, bid)
    assert jnp.allclose(out, ref, atol=1e-4, rtol=1e-4), float(
        jnp.max(jnp.abs(out - ref)))

    print("KERNEL_OK")
</pallas_src>

<mosaic_0001>
module attributes {stable_mosaic.version = 11 : i64} {
  func.func @_fused_lstm_decoder_kernel(%arg0: memref<64x64xf32, #tpu.memory_space<vmem>>, %arg1: memref<64x256xf32, #tpu.memory_space<vmem>>, %arg2: memref<1x256xf32, #tpu.memory_space<vmem>>, %arg3: memref<64x256xf32, #tpu.memory_space<vmem>>, %arg4: memref<64x256xf32, #tpu.memory_space<vmem>>, %arg5: memref<1x256xf32, #tpu.memory_space<vmem>>, %arg6: memref<64x256xf32, #tpu.memory_space<vmem>>, %arg7: memref<64x64xf32, #tpu.memory_space<vmem>>, %arg8: memref<64x256xf32, #tpu.memory_space<vmem>>) attributes {dimension_semantics = [], scalar_prefetch = 0 : i64, scratch_operands = 1 : i64, tpu.core_type = #tpu.core_type<tc>} {
    %c0 = arith.constant 0 : index
    %c0_0 = arith.constant 0 : index
    %0 = vector.load %arg0[%c0, %c0_0] : memref<64x64xf32, #tpu.memory_space<vmem>>, vector<64x64xf32>
    %c0_1 = arith.constant 0 : index
    %c0_2 = arith.constant 0 : index
    %1 = vector.load %arg1[%c0_1, %c0_2] : memref<64x256xf32, #tpu.memory_space<vmem>>, vector<64x256xf32>
    %c0_3 = arith.constant 0 : index
    %c0_4 = arith.constant 0 : index
    %2 = vector.load %arg2[%c0_3, %c0_4] : memref<1x256xf32, #tpu.memory_space<vmem>>, vector<1x256xf32>
    %c0_5 = arith.constant 0 : index
    %c0_6 = arith.constant 0 : index
    %3 = vector.load %arg3[%c0_5, %c0_6] : memref<64x256xf32, #tpu.memory_space<vmem>>, vector<64x256xf32>
    %cst = arith.constant dense<0.000000e+00> : vector<64x256xf32>
    %4 = tpu.matmul %0, %1, %cst {dimension_numbers = #tpu.dot_dimension_numbers<[1], [0], [0], [1], [0, 0, 1, 1], [], []>} : vector<64x64xf32>, vector<64x256xf32>, vector<64x256xf32> -> vector<64x256xf32>
    %5 = vector.broadcast %2 : vector<1x256xf32> to vector<64x256xf32>
    %6 = arith.addf %4, %5 : vector<64x256xf32>
    %c0_7 = arith.constant 0 : index
    %c0_8 = arith.constant 0 : index
    %7 = vector.load %arg8[%c0_7, %c0_8] : memref<64x256xf32, #tpu.memory_space<vmem>>, vector<64x256xf32>
    tpu.vector_store %arg8[%c0_7, %c0_8], %6 {strides = array<i32>} : memref<64x256xf32, #tpu.memory_space<vmem>>, vector<64x256xf32>,
    %cst_9 = arith.constant 0.000000e+00 : f32
    %8 = vector.broadcast %cst_9 : f32 to vector<8x64xf32>
    %cst_10 = arith.constant 0.000000e+00 : f32
    %9 = vector.broadcast %cst_10 : f32 to vector<8x64xf32>
    %c0_11 = arith.constant 0 : index
    %c0_12 = arith.constant 0 : index
    %10 = vector.load %arg8[%c0_11, %c0_12] : memref<64x256xf32, #tpu.memory_space<vmem>>, vector<8x128xf32>
    %c56 = arith.constant 56 : index
    %c128 = arith.constant 128 : index
    %11 = vector.load %arg8[%c56, %c128] : memref<64x256xf32, #tpu.memory_space<vmem>>, vector<8x128xf32>
    %12 = tpu.concatenate %10, %11 in 1 : vector<8x128xf32>, vector<8x128xf32> -> vector<8x256xf32>
    %cst_13 = arith.constant dense<0.000000e+00> : vector<8x256xf32>
    %13 = tpu.matmul %8, %3, %cst_13 {dimension_numbers = #tpu.dot_dimension_numbers<[1], [0], [0], [1], [0, 0, 1, 1], [], []>} : vector<8x64xf32>, vector<64x256xf32>, vector<8x256xf32> -> vector<8x256xf32>
    %14 = arith.addf %12, %13 : vector<8x256xf32>
    %15 = arith.negf %14 : vector<8x256xf32>
    %16 = math.exp %15 : vector<8x256xf32>
    %cst_14 = arith.constant 1.000000e+00 : f32
    %17 = vector.broadcast %cst_14 : f32 to vector<8x256xf32>
    %18 = arith.addf %17, %16 : vector<8x256xf32>
    %19 = arith.divf %17, %18 : vector<8x256xf32>
    %20 = vector.extract_strided_slice %19 {offsets = [0, 0], sizes = [8, 32], strides = [1, 1]} : vector<8x256xf32> to vector<8x32xf32>
    %21 = vector.extract_strided_slice %19 {offsets = [0, 128], sizes = [8, 32], strides = [1, 1]} : vector<8x256xf32> to vector<8x32xf32>
    %22 = tpu.concatenate %20, %21 in 1 : vector<8x32xf32>, vector<8x32xf32> -> vector<8x64xf32>
    %23 = vector.extract_strided_slice %19 {offsets = [0, 32], sizes = [8, 32], strides = [1, 1]} : vector<8x256xf32> to vector<8x32xf32>
    %24 = vector.extract_strided_slice %19 {offsets = [0, 160], sizes = [8, 32], strides = [1, 1]} : vector<8x256xf32> to vector<8x32xf32>
    %25 = tpu.concatenate %23, %24 in 1 : vector<8x32xf32>, vector<8x32xf32> -> vector<8x64xf32>
    %26 = vector.extract_strided_slice %19 {offsets = [0, 96], sizes = [8, 32], strides = [1, 1]} : vector<8x256xf32> to vector<8x32xf32>
    %27 = vector.extract_strided_slice %19 {offsets = [0, 224], sizes = [8, 32], strides = [1, 1]} : vector<8x256xf32> to vector<8x32xf32>
    %28 = tpu.concatenate %26, %27 in 1 : vector<8x32xf32>, vector<8x32xf32> -> vector<8x64xf32>
    %29 = vector.extract_strided_slice %14 {offsets = [0, 64], sizes = [8, 32], strides = [1, 1]} : vector<8x256xf32> to vector<8x32xf32>
    %30 = vector.extract_strided_slice %14 {offsets = [0, 192], sizes = [8, 32], strides = [1, 1]} : vector<8x256xf32> to vector<8x32xf32>
    %31 = tpu.concatenate %29, %30 in 1 : vector<8x32xf32>, vector<8x32xf32> -> vector<8x64xf32>
    %32 = math.tanh %31 : vector<8x64xf32>
    %33 = arith.mulf %25, %9 : vector<8x64xf32>
    %34 = arith.mulf %22, %32 : vector<8x64xf32>
    %35 = arith.addf %33, %34 : vector<8x64xf32>
    %36 = math.tanh %35 : vector<8x64xf32>
    %37 = arith.mulf %28, %36 : vector<8x64xf32>
    %38 = vector.extract_strided_slice %37 {offsets = [0, 0], sizes = [8, 32], strides = [1, 1]} : vector<8x64xf32> to vector<8x32xf32>
    %39 = vector.extract_strided_slice %37 {offsets = [0, 32], sizes = [8, 32], strides = [1, 1]} : vector<8x64xf32> to vector<8x32xf32>
    %c8 = arith.constant 8 : index
    %c0_15 = arith.constant 0 : index
    %40 = vector.load %arg8[%c8, %c0_15] : memref<64x256xf32, #tpu.memory_space<vmem>>, vector<8x128xf32>
    %c48 = arith.constant 48 : index
    %c128_16 = arith.constant 128 : index
    %41 = vector.load %arg8[%c48, %c128_16] : memref<64x256xf32, #tpu.memory_space<vmem>>, vector<8x128xf32>
    %42 = tpu.concatenate %40, %41 in 1 : vector<8x128xf32>, vector<8x128xf32> -> vector<8x256xf32>
    %cst_17 = arith.constant dense<0.000000e+00> : vector<8x256xf32>
    %43 = tpu.matmul %37, %3, %cst_17 {dimension_numbers = #tpu.dot_dimension_numbers<[1], [0], [0], [1], [0, 0, 1, 1], [], []>} : vector<8x64xf32>, vector<64x256xf32>, vector<8x256xf32> -> vector<8x256xf32>
    %44 = arith.addf %42, %43 : vector<8x256xf32>
    %45 = arith.negf %44 : vector<8x256xf32>
    %46 = math.exp %45 : vector<8x256xf32>
    %cst_18 = arith.constant 1.000000e+00 : f32
    %47 = vector.broadcast %cst_18 : f32 to vector<8x256xf32>
    %48 = arith.addf %47, %46 : vector<8x256xf32>
    %49 = arith.divf %47, %48 : vector<8x256xf32>
    %50 = vector.extract_strided_slice %49 {offsets = [0, 0], sizes = [8, 32], strides = [1, 1]} : vector<8x256xf32> to vector<8x32xf32>
    %51 = vector.extract_strided_slice %49 {offsets = [0, 128], sizes = [8, 32], strides = [1, 1]} : vector<8x256xf32> to vector<8x32xf32>
    %52 = tpu.concatenate %50, %51 in 1 : vector<8x32xf32>, vector<8x32xf32> -> vector<8x64xf32>
    %53 = vector.extract_strided_slice %49 {offsets = [0, 32], sizes = [8, 32], strides = [1, 1]} : vector<8x256xf32> to vector<8x32xf32>
    %54 = vector.extract_strided_slice %49 {offsets = [0, 160], sizes = [8, 32], strides = [1, 1]} : vector<8x256xf32> to vector<8x32xf32>
    %55 = tpu.concatenate %53, %54 in 1 : vector<8x32xf32>, vector<8x32xf32> -> vector<8x64xf32>
    %56 = vector.extract_strided_slice %49 {offsets = [0, 96], sizes = [8, 32], strides = [1, 1]} : vector<8x256xf32> to vector<8x32xf32>
    %57 = vector.extract_strided_slice %49 {offsets = [0, 224], sizes = [8, 32], strides = [1, 1]} : vector<8x256xf32> to vector<8x32xf32>
    %58 = tpu.concatenate %56, %57 in 1 : vector<8x32xf32>, vector<8x32xf32> -> vector<8x64xf32>
    %59 = vector.extract_strided_slice %44 {offsets = [0, 64], sizes = [8, 32], strides = [1, 1]} : vector<8x256xf32> to vector<8x32xf32>
    %60 = vector.extract_strided_slice %44 {offsets = [0, 192], sizes = [8, 32], strides = [1, 1]} : vector<8x256xf32> to vector<8x32xf32>
    %61 = tpu.concatenate %59, %60 in 1 : vector<8x32xf32>, vector<8x32xf32> -> vector<8x64xf32>
    %62 = math.tanh %61 : vector<8x64xf32>
    %63 = arith.mulf %55, %35 : vector<8x64xf32>
    %64 = arith.mulf %52, %62 : vector<8x64xf32>
    %65 = arith.addf %63, %64 : vector<8x64xf32>
    %66 = math.tanh %65 : vector<8x64xf32>
    %67 = arith.mulf %58, %66 : vector<8x64xf32>
    %68 = vector.extract_strided_slice %67 {offsets = [0, 0], sizes = [8, 32], strides = [1, 1]} : vector<8x64xf32> to vector<8x32xf32>
    %69 = vector.extract_strided_slice %67 {offsets = [0, 32], sizes = [8, 32], strides = [1, 1]} : vector<8x64xf32> to vector<8x32xf32>
    %c16 = arith.constant 16 : index
    %c0_19 = arith.constant 0 : index
    %70 = vector.load %arg8[%c16, %c0_19] : memref<64x256xf32, #tpu.memory_space<vmem>>, vector<8x128xf32>
    %c40 = arith.constant 40 : index
    %c128_20 = arith.constant 128 : index
    %71 = vector.load %arg8[%c40, %c128_20] : memref<64x256xf32, #tpu.memory_space<vmem>>, vector<8x128xf32>
    %72 = tpu.concatenate %70, %71 in 1 : vector<8x128xf32>, vector<8x128xf32> -> vector<8x256xf32>
    %cst_21 = arith.constant dense<0.000000e+00> : vector<8x256xf32>
    %73 = tpu.matmul %67, %3, %cst_21 {dimension_numbers = #tpu.dot_dimension_numbers<[1], [0], [0], [1], [0, 0, 1, 1], [], []>} : vector<8x64xf32>, vector<64x256xf32>, vector<8x256xf32> -> vector<8x256xf32>
    %74 = arith.addf %72, %73 : vector<8x256xf32>
    %75 = arith.negf %74 : vector<8x256xf32>
    %76 = math.exp %75 : vector<8x256xf32>
    %cst_22 = arith.constant 1.000000e+00 : f32
    %77 = vector.broadcast %cst_22 : f32 to vector<8x256xf32>
    %78 = arith.addf %77, %76 : vector<8x256xf32>
    %79 = arith.divf %77, %78 : vector<8x256xf32>
    %80 = vector.extract_strided_slice %79 {offsets = [0, 0], sizes = [8, 32], strides = [1, 1]} : vector<8x256xf32> to vector<8x32xf32>
    %81 = vector.extract_strided_slice %79 {offsets = [0, 128], sizes = [8, 32], strides = [1, 1]} : vector<8x256xf32> to vector<8x32xf32>
    %82 = tpu.concatenate %80, %81 in 1 : vector<8x32xf32>, vector<8x32xf32> -> vector<8x64xf32>
    %83 = vector.extract_strided_slice %79 {offsets = [0, 32], sizes = [8, 32], strides = [1, 1]} : vector<8x256xf32> to vector<8x32xf32>
    %84 = vector.extract_strided_slice %79 {offsets = [0, 160], sizes = [8, 32], strides = [1, 1]} : vector<8x256xf32> to vector<8x32xf32>
    %85 = tpu.concatenate %83, %84 in 1 : vector<8x32xf32>, vector<8x32xf32> -> vector<8x64xf32>
    %86 = vector.extract_strided_slice %79 {offsets = [0, 96], sizes = [8, 32], strides = [1, 1]} : vector<8x256xf32> to vector<8x32xf32>
    %87 = vector.extract_strided_slice %79 {offsets = [0, 224], sizes = [8, 32], strides = [1, 1]} : vector<8x256xf32> to vector<8x32xf32>
    %88 = tpu.concatenate %86, %87 in 1 : vector<8x32xf32>, vector<8x32xf32> -> vector<8x64xf32>
    %89 = vector.extract_strided_slice %74 {offsets = [0, 64], sizes = [8, 32], strides = [1, 1]} : vector<8x256xf32> to vector<8x32xf32>
    %90 = vector.extract_strided_slice %74 {offsets = [0, 192], sizes = [8, 32], strides = [1, 1]} : vector<8x256xf32> to vector<8x32xf32>
    %91 = tpu.concatenate %89, %90 in 1 : vector<8x32xf32>, vector<8x32xf32> -> vector<8x64xf32>
    %92 = math.tanh %91 : vector<8x64xf32>
    %93 = arith.mulf %85, %65 : vector<8x64xf32>
    %94 = arith.mulf %82, %92 : vector<8x64xf32>
    %95 = arith.addf %93, %94 : vector<8x64xf32>
    %96 = math.tanh %95 : vector<8x64xf32>
    %97 = arith.mulf %88, %96 : vector<8x64xf32>
    %98 = vector.extract_strided_slice %97 {offsets = [0, 0], sizes = [8, 32], strides = [1, 1]} : vector<8x64xf32> to vector<8x32xf32>
    %99 = vector.extract_strided_slice %97 {offsets = [0, 32], sizes = [8, 32], strides = [1, 1]} : vector<8x64xf32> to vector<8x32xf32>
    %c24 = arith.constant 24 : index
    %c0_23 = arith.constant 0 : index
    %100 = vector.load %arg8[%c24, %c0_23] : memref<64x256xf32, #tpu.memory_space<vmem>>, vector<8x128xf32>
    %c32 = arith.constant 32 : index
    %c128_24 = arith.constant 128 : index
    %101 = vector.load %arg8[%c32, %c128_24] : memref<64x256xf32, #tpu.memory_space<vmem>>, vector<8x128xf32>
    %102 = tpu.concatenate %100, %101 in 1 : vector<8x128xf32>, vector<8x128xf32> -> vector<8x256xf32>
    %cst_25 = arith.constant dense<0.000000e+00> : vector<8x256xf32>
    %103 = tpu.matmul %97, %3, %cst_25 {dimension_numbers = #tpu.dot_dimension_numbers<[1], [0], [0], [1], [0, 0, 1, 1], [], []>} : vector<8x64xf32>, vector<64x256xf32>, vector<8x256xf32> -> vector<8x256xf32>
    %104 = arith.addf %102, %103 : vector<8x256xf32>
    %105 = arith.negf %104 : vector<8x256xf32>
    %106 = math.exp %105 : vector<8x256xf32>
    %cst_26 = arith.constant 1.000000e+00 : f32
    %107 = vector.broadcast %cst_26 : f32 to vector<8x256xf32>
    %108 = arith.addf %107, %106 : vector<8x256xf32>
    %109 = arith.divf %107, %108 : vector<8x256xf32>
    %110 = vector.extract_strided_slice %109 {offsets = [0, 0], sizes = [8, 32], strides = [1, 1]} : vector<8x256xf32> to vector<8x32xf32>
    %111 = vector.extract_strided_slice %109 {offsets = [0, 128], sizes = [8, 32], strides = [1, 1]} : vector<8x256xf32> to vector<8x32xf32>
    %112 = tpu.concatenate %110, %111 in 1 : vector<8x32xf32>, vector<8x32xf32> -> vector<8x64xf32>
    %113 = vector.extract_strided_slice %109 {offsets = [0, 32], sizes = [8, 32], strides = [1, 1]} : vector<8x256xf32> to vector<8x32xf32>
    %114 = vector.extract_strided_slice %109 {offsets = [0, 160], sizes = [8, 32], strides = [1, 1]} : vector<8x256xf32> to vector<8x32xf32>
    %115 = tpu.concatenate %113, %114 in 1 : vector<8x32xf32>, vector<8x32xf32> -> vector<8x64xf32>
    %116 = vector.extract_strided_slice %109 {offsets = [0, 96], sizes = [8, 32], strides = [1, 1]} : vector<8x256xf32> to vector<8x32xf32>
    %117 = vector.extract_strided_slice %109 {offsets = [0, 224], sizes = [8, 32], strides = [1, 1]} : vector<8x256xf32> to vector<8x32xf32>
    %118 = tpu.concatenate %116, %117 in 1 : vector<8x32xf32>, vector<8x32xf32> -> vector<8x64xf32>
    %119 = vector.extract_strided_slice %104 {offsets = [0, 64], sizes = [8, 32], strides = [1, 1]} : vector<8x256xf32> to vector<8x32xf32>
    %120 = vector.extract_strided_slice %104 {offsets = [0, 192], sizes = [8, 32], strides = [1, 1]} : vector<8x256xf32> to vector<8x32xf32>
    %121 = tpu.concatenate %119, %120 in 1 : vector<8x32xf32>, vector<8x32xf32> -> vector<8x64xf32>
    %122 = math.tanh %121 : vector<8x64xf32>
    %123 = arith.mulf %115, %95 : vector<8x64xf32>
    %124 = arith.mulf %112, %122 : vector<8x64xf32>
    %125 = arith.addf %123, %124 : vector<8x64xf32>
    %126 = math.tanh %125 : vector<8x64xf32>
    %127 = arith.mulf %118, %126 : vector<8x64xf32>
    %128 = vector.extract_strided_slice %127 {offsets = [0, 0], sizes = [8, 32], strides = [1, 1]} : vector<8x64xf32> to vector<8x32xf32>
    %129 = vector.extract_strided_slice %127 {offsets = [0, 32], sizes = [8, 32], strides = [1, 1]} : vector<8x64xf32> to vector<8x32xf32>
    %c32_27 = arith.constant 32 : index
    %c0_28 = arith.constant 0 : index
    %130 = vector.load %arg8[%c32_27, %c0_28] : memref<64x256xf32, #tpu.memory_space<vmem>>, vector<8x128xf32>
    %c24_29 = arith.constant 24 : index
    %c128_30 = arith.constant 128 : index
    %131 = vector.load %arg8[%c24_29, %c128_30] : memref<64x256xf32, #tpu.memory_space<vmem>>, vector<8x128xf32>
    %132 = tpu.concatenate %130, %131 in 1 : vector<8x128xf32>, vector<8x128xf32> -> vector<8x256xf32>
    %cst_31 = arith.constant dense<0.000000e+00> : vector<8x256xf32>
    %133 = tpu.matmul %127, %3, %cst_31 {dimension_numbers = #tpu.dot_dimension_numbers<[1], [0], [0], [1], [0, 0, 1, 1], [], []>} : vector<8x64xf32>, vector<64x256xf32>, vector<8x256xf32> -> vector<8x256xf32>
    %134 = arith.addf %132, %133 : vector<8x256xf32>
    %135 = arith.negf %134 : vector<8x256xf32>
    %136 = math.exp %135 : vector<8x256xf32>
    %cst_32 = arith.constant 1.000000e+00 : f32
    %137 = vector.broadcast %cst_32 : f32 to vector<8x256xf32>
    %138 = arith.addf %137, %136 : vector<8x256xf32>
    %139 = arith.divf %137, %138 : vector<8x256xf32>
    %140 = vector.extract_strided_slice %139 {offsets = [0, 0], sizes = [8, 32], strides = [1, 1]} : vector<8x256xf32> to vector<8x32xf32>
    %141 = vector.extract_strided_slice %139 {offsets = [0, 128], sizes = [8, 32], strides = [1, 1]} : vector<8x256xf32> to vector<8x32xf32>
    %142 = tpu.concatenate %140, %141 in 1 : vector<8x32xf32>, vector<8x32xf32> -> vector<8x64xf32>
    %143 = vector.extract_strided_slice %139 {offsets = [0, 32], sizes = [8, 32], strides = [1, 1]} : vector<8x256xf32> to vector<8x32xf32>
    %144 = vector.extract_strided_slice %139 {offsets = [0, 160], sizes = [8, 32], strides = [1, 1]} : vector<8x256xf32> to vector<8x32xf32>
    %145 = tpu.concatenate %143, %144 in 1 : vector<8x32xf32>, vector<8x32xf32> -> vector<8x64xf32>
    %146 = vector.extract_strided_slice %139 {offsets = [0, 96], sizes = [8, 32], strides = [1, 1]} : vector<8x256xf32> to vector<8x32xf32>
    %147 = vector.extract_strided_slice %139 {offsets = [0, 224], sizes = [8, 32], strides = [1, 1]} : vector<8x256xf32> to vector<8x32xf32>
    %148 = tpu.concatenate %146, %147 in 1 : vector<8x32xf32>, vector<8x32xf32> -> vector<8x64xf32>
    %149 = vector.extract_strided_slice %134 {offsets = [0, 64], sizes = [8, 32], strides = [1, 1]} : vector<8x256xf32> to vector<8x32xf32>
    %150 = vector.extract_strided_slice %134 {offsets = [0, 192], sizes = [8, 32], strides = [1, 1]} : vector<8x256xf32> to vector<8x32xf32>
    %151 = tpu.concatenate %149, %150 in 1 : vector<8x32xf32>, vector<8x32xf32> -> vector<8x64xf32>
    %152 = math.tanh %151 : vector<8x64xf32>
    %153 = arith.mulf %145, %125 : vector<8x64xf32>
    %154 = arith.mulf %142, %152 : vector<8x64xf32>
    %155 = arith.addf %153, %154 : vector<8x64xf32>
    %156 = math.tanh %155 : vector<8x64xf32>
    %157 = arith.mulf %148, %156 : vector<8x64xf32>
    %158 = vector.extract_strided_slice %157 {offsets = [0, 0], sizes = [8, 32], strides = [1, 1]} : vector<8x64xf32> to vector<8x32xf32>
    %159 = vector.extract_strided_slice %157 {offsets = [0, 32], sizes = [8, 32], strides = [1, 1]} : vector<8x64xf32> to vector<8x32xf32>
    %c40_33 = arith.constant 40 : index
    %c0_34 = arith.constant 0 : index
    %160 = vector.load %arg8[%c40_33, %c0_34] : memref<64x256xf32, #tpu.memory_space<vmem>>, vector<8x128xf32>
    %c16_35 = arith.constant 16 : index
    %c128_36 = arith.constant 128 : index
    %161 = vector.load %arg8[%c16_35, %c128_36] : memref<64x256xf32, #tpu.memory_space<vmem>>, vector<8x128xf32>
    %162 = tpu.concatenate %160, %161 in 1 : vector<8x128xf32>, vector<8x128xf32> -> vector<8x256xf32>
    %cst_37 = arith.constant dense<0.000000e+00> : vector<8x256xf32>
    %163 = tpu.matmul %157, %3, %cst_37 {dimension_numbers = #tpu.dot_dimension_numbers<[1], [0], [0], [1], [0, 0, 1, 1], [], []>} : vector<8x64xf32>, vector<64x256xf32>, vector<8x256xf32> -> vector<8x256xf32>
    %164 = arith.addf %162, %163 : vector<8x256xf32>
    %165 = arith.negf %164 : vector<8x256xf32>
    %166 = math.exp %165 : vector<8x256xf32>
    %cst_38 = arith.constant 1.000000e+00 : f32
    %167 = vector.broadcast %cst_38 : f32 to vector<8x256xf32>
    %168 = arith.addf %167, %166 : vector<8x256xf32>
    %169 = arith.divf %167, %168 : vector<8x256xf32>
    %170 = vector.extract_strided_slice %169 {offsets = [0, 0], sizes = [8, 32], strides = [1, 1]} : vector<8x256xf32> to vector<8x32xf32>
    %171 = vector.extract_strided_slice %169 {offsets = [0, 128], sizes = [8, 32], strides = [1, 1]} : vector<8x256xf32> to vector<8x32xf32>
    %172 = tpu.concatenate %170, %171 in 1 : vector<8x32xf32>, vector<8x32xf32> -> vector<8x64xf32>
    %173 = vector.extract_strided_slice %169 {offsets = [0, 32], sizes = [8, 32], strides = [1, 1]} : vector<8x256xf32> to vector<8x32xf32>
    %174 = vector.extract_strided_slice %169 {offsets = [0, 160], sizes = [8, 32], strides = [1, 1]} : vector<8x256xf32> to vector<8x32xf32>
    %175 = tpu.concatenate %173, %174 in 1 : vector<8x32xf32>, vector<8x32xf32> -> vector<8x64xf32>
    %176 = vector.extract_strided_slice %169 {offsets = [0, 96], sizes = [8, 32], strides = [1, 1]} : vector<8x256xf32> to vector<8x32xf32>
    %177 = vector.extract_strided_slice %169 {offsets = [0, 224], sizes = [8, 32], strides = [1, 1]} : vector<8x256xf32> to vector<8x32xf32>
    %178 = tpu.concatenate %176, %177 in 1 : vector<8x32xf32>, vector<8x32xf32> -> vector<8x64xf32>
    %179 = vector.extract_strided_slice %164 {offsets = [0, 64], sizes = [8, 32], strides = [1, 1]} : vector<8x256xf32> to vector<8x32xf32>
    %180 = vector.extract_strided_slice %164 {offsets = [0, 192], sizes = [8, 32], strides = [1, 1]} : vector<8x256xf32> to vector<8x32xf32>
    %181 = tpu.concatenate %179, %180 in 1 : vector<8x32xf32>, vector<8x32xf32> -> vector<8x64xf32>
    %182 = math.tanh %181 : vector<8x64xf32>
    %183 = arith.mulf %175, %155 : vector<8x64xf32>
    %184 = arith.mulf %172, %182 : vector<8x64xf32>
    %185 = arith.addf %183, %184 : vector<8x64xf32>
    %186 = math.tanh %185 : vector<8x64xf32>
    %187 = arith.mulf %178, %186 : vector<8x64xf32>
    %188 = vector.extract_strided_slice %187 {offsets = [0, 0], sizes = [8, 32], strides = [1, 1]} : vector<8x64xf32> to vector<8x32xf32>
    %189 = vector.extract_strided_slice %187 {offsets = [0, 32], sizes = [8, 32], strides = [1, 1]} : vector<8x64xf32> to vector<8x32xf32>
    %c48_39 = arith.constant 48 : index
    %c0_40 = arith.constant 0 : index
    %190 = vector.load %arg8[%c48_39, %c0_40] : memref<64x256xf32, #tpu.memory_space<vmem>>, vector<8x128xf32>
    %c8_41 = arith.constant 8 : index
    %c128_42 = arith.constant 128 : index
    %191 = vector.load %arg8[%c8_41, %c128_42] : memref<64x256xf32, #tpu.memory_space<vmem>>, vector<8x128xf32>
    %192 = tpu.concatenate %190, %191 in 1 : vector<8x128xf32>, vector<8x128xf32> -> vector<8x256xf32>
    %cst_43 = arith.constant dense<0.000000e+00> : vector<8x256xf32>
    %193 = tpu.matmul %187, %3, %cst_43 {dimension_numbers = #tpu.dot_dimension_numbers<[1], [0], [0], [1], [0, 0, 1, 1], [], []>} : vector<8x64xf32>, vector<64x256xf32>, vector<8x256xf32> -> vector<8x256xf32>
    %194 = arith.addf %192, %193 : vector<8x256xf32>
    %195 = arith.negf %194 : vector<8x256xf32>
    %196 = math.exp %195 : vector<8x256xf32>
    %cst_44 = arith.constant 1.000000e+00 : f32
    %197 = vector.broadcast %cst_44 : f32 to vector<8x256xf32>
    %198 = arith.addf %197, %196 : vector<8x256xf32>
    %199 = arith.divf %197, %198 : vector<8x256xf32>
    %200 = vector.extract_strided_slice %199 {offsets = [0, 0], sizes = [8, 32], strides = [1, 1]} : vector<8x256xf32> to vector<8x32xf32>
    %201 = vector.extract_strided_slice %199 {offsets = [0, 128], sizes = [8, 32], strides = [1, 1]} : vector<8x256xf32> to vector<8x32xf32>
    %202 = tpu.concatenate %200, %201 in 1 : vector<8x32xf32>, vector<8x32xf32> -> vector<8x64xf32>
    %203 = vector.extract_strided_slice %199 {offsets = [0, 32], sizes = [8, 32], strides = [1, 1]} : vector<8x256xf32> to vector<8x32xf32>
    %204 = vector.extract_strided_slice %199 {offsets = [0, 160], sizes = [8, 32], strides = [1, 1]} : vector<8x256xf32> to vector<8x32xf32>
    %205 = tpu.concatenate %203, %204 in 1 : vector<8x32xf32>, vector<8x32xf32> -> vector<8x64xf32>
    %206 = vector.extract_strided_slice %199 {offsets = [0, 96], sizes = [8, 32], strides = [1, 1]} : vector<8x256xf32> to vector<8x32xf32>
    %207 = vector.extract_strided_slice %199 {offsets = [0, 224], sizes = [8, 32], strides = [1, 1]} : vector<8x256xf32> to vector<8x32xf32>
    %208 = tpu.concatenate %206, %207 in 1 : vector<8x32xf32>, vector<8x32xf32> -> vector<8x64xf32>
    %209 = vector.extract_strided_slice %194 {offsets = [0, 64], sizes = [8, 32], strides = [1, 1]} : vector<8x256xf32> to vector<8x32xf32>
    %210 = vector.extract_strided_slice %194 {offsets = [0, 192], sizes = [8, 32], strides = [1, 1]} : vector<8x256xf32> to vector<8x32xf32>
    %211 = tpu.concatenate %209, %210 in 1 : vector<8x32xf32>, vector<8x32xf32> -> vector<8x64xf32>
    %212 = math.tanh %211 : vector<8x64xf32>
    %213 = arith.mulf %205, %185 : vector<8x64xf32>
    %214 = arith.mulf %202, %212 : vector<8x64xf32>
    %215 = arith.addf %213, %214 : vector<8x64xf32>
    %216 = math.tanh %215 : vector<8x64xf32>
    %217 = arith.mulf %208, %216 : vector<8x64xf32>
    %218 = vector.extract_strided_slice %217 {offsets = [0, 0], sizes = [8, 32], strides = [1, 1]} : vector<8x64xf32> to vector<8x32xf32>
    %219 = vector.extract_strided_slice %217 {offsets = [0, 32], sizes = [8, 32], strides = [1, 1]} : vector<8x64xf32> to vector<8x32xf32>
    %c56_45 = arith.constant 56 : index
    %c0_46 = arith.constant 0 : index
    %220 = vector.load %arg8[%c56_45, %c0_46] : memref<64x256xf32, #tpu.memory_space<vmem>>, vector<8x128xf32>
    %c0_47 = arith.constant 0 : index
    %c128_48 = arith.constant 128 : index
    %221 = vector.load %arg8[%c0_47, %c128_48] : memref<64x256xf32, #tpu.memory_space<vmem>>, vector<8x128xf32>
    %222 = tpu.concatenate %220, %221 in 1 : vector<8x128xf32>, vector<8x128xf32> -> vector<8x256xf32>
    %cst_49 = arith.constant dense<0.000000e+00> : vector<8x256xf32>
    %223 = tpu.matmul %217, %3, %cst_49 {dimension_numbers = #tpu.dot_dimension_numbers<[1], [0], [0], [1], [0, 0, 1, 1], [], []>} : vector<8x64xf32>, vector<64x256xf32>, vector<8x256xf32> -> vector<8x256xf32>
    %224 = arith.addf %222, %223 : vector<8x256xf32>
    %225 = arith.negf %224 : vector<8x256xf32>
    %226 = math.exp %225 : vector<8x256xf32>
    %cst_50 = arith.constant 1.000000e+00 : f32
    %227 = vector.broadcast %cst_50 : f32 to vector<8x256xf32>
    %228 = arith.addf %227, %226 : vector<8x256xf32>
    %229 = arith.divf %227, %228 : vector<8x256xf32>
    %230 = vector.extract_strided_slice %229 {offsets = [0, 0], sizes = [8, 32], strides = [1, 1]} : vector<8x256xf32> to vector<8x32xf32>
    %231 = vector.extract_strided_slice %229 {offsets = [0, 128], sizes = [8, 32], strides = [1, 1]} : vector<8x256xf32> to vector<8x32xf32>
    %232 = tpu.concatenate %230, %231 in 1 : vector<8x32xf32>, vector<8x32xf32> -> vector<8x64xf32>
    %233 = vector.extract_strided_slice %229 {offsets = [0, 32], sizes = [8, 32], strides = [1, 1]} : vector<8x256xf32> to vector<8x32xf32>
    %234 = vector.extract_strided_slice %229 {offsets = [0, 160], sizes = [8, 32], strides = [1, 1]} : vector<8x256xf32> to vector<8x32xf32>
    %235 = tpu.concatenate %233, %234 in 1 : vector<8x32xf32>, vector<8x32xf32> -> vector<8x64xf32>
    %236 = vector.extract_strided_slice %229 {offsets = [0, 96], sizes = [8, 32], strides = [1, 1]} : vector<8x256xf32> to vector<8x32xf32>
    %237 = vector.extract_strided_slice %229 {offsets = [0, 224], sizes = [8, 32], strides = [1, 1]} : vector<8x256xf32> to vector<8x32xf32>
    %238 = tpu.concatenate %236, %237 in 1 : vector<8x32xf32>, vector<8x32xf32> -> vector<8x64xf32>
    %239 = vector.extract_strided_slice %224 {offsets = [0, 64], sizes = [8, 32], strides = [1, 1]} : vector<8x256xf32> to vector<8x32xf32>
    %240 = vector.extract_strided_slice %224 {offsets = [0, 192], sizes = [8, 32], strides = [1, 1]} : vector<8x256xf32> to vector<8x32xf32>
    %241 = tpu.concatenate %239, %240 in 1 : vector<8x32xf32>, vector<8x32xf32> -> vector<8x64xf32>
    %242 = math.tanh %241 : vector<8x64xf32>
    %243 = arith.mulf %235, %215 : vector<8x64xf32>
    %244 = arith.mulf %232, %242 : vector<8x64xf32>
    %245 = arith.addf %243, %244 : vector<8x64xf32>
    %246 = math.tanh %245 : vector<8x64xf32>
    %247 = arith.mulf %238, %246 : vector<8x64xf32>
    %248 = vector.extract_strided_slice %247 {offsets = [0, 0], sizes = [8, 32], strides = [1, 1]} : vector<8x64xf32> to vector<8x32xf32>
    %249 = vector.extract_strided_slice %247 {offsets = [0, 32], sizes = [8, 32], strides = [1, 1]} : vector<8x64xf32> to vector<8x32xf32>
    %250 = tpu.concatenate %38, %249 in 1 : vector<8x32xf32>, vector<8x32xf32> -> vector<8x64xf32>
    %251 = tpu.concatenate %68, %219 in 1 : vector<8x32xf32>, vector<8x32xf32> -> vector<8x64xf32>
    %252 = tpu.concatenate %98, %189 in 1 : vector<8x32xf32>, vector<8x32xf32> -> vector<8x64xf32>
    %253 = tpu.concatenate %128, %159 in 1 : vector<8x32xf32>, vector<8x32xf32> -> vector<8x64xf32>
    %254 = tpu.concatenate %158, %129 in 1 : vector<8x32xf32>, vector<8x32xf32> -> vector<8x64xf32>
    %255 = tpu.concatenate %188, %99 in 1 : vector<8x32xf32>, vector<8x32xf32> -> vector<8x64xf32>
    %256 = tpu.concatenate %218, %69 in 1 : vector<8x32xf32>, vector<8x32xf32> -> vector<8x64xf32>
    %257 = tpu.concatenate %248, %39 in 1 : vector<8x32xf32>, vector<8x32xf32> -> vector<8x64xf32>
    %258 = tpu.concatenate %250, %251, %252, %253, %254, %255, %256, %257 in 0 : vector<8x64xf32>, vector<8x64xf32>, vector<8x64xf32>, vector<8x64xf32>, vector<8x64xf32>, vector<8x64xf32>, vector<8x64xf32>, vector<8x64xf32> -> vector<64x64xf32>
    %c0_51 = arith.constant 0 : index
    %c0_52 = arith.constant 0 : index
    %259 = vector.load %arg4[%c0_51, %c0_52] : memref<64x256xf32, #tpu.memory_space<vmem>>, vector<64x256xf32>
    %c0_53 = arith.constant 0 : index
    %c0_54 = arith.constant 0 : index
    %260 = vector.load %arg5[%c0_53, %c0_54] : memref<1x256xf32, #tpu.memory_space<vmem>>, vector<1x256xf32>
    %c0_55 = arith.constant 0 : index
    %c0_56 = arith.constant 0 : index
    %261 = vector.load %arg6[%c0_55, %c0_56] : memref<64x256xf32, #tpu.memory_space<vmem>>, vector<64x256xf32>
    %cst_57 = arith.constant dense<0.000000e+00> : vector<64x256xf32>
    %262 = tpu.matmul %258, %259, %cst_57 {dimension_numbers = #tpu.dot_dimension_numbers<[1], [0], [0], [1], [0, 0, 1, 1], [], []>} : vector<64x64xf32>, vector<64x256xf32>, vector<64x256xf32> -> vector<64x256xf32>
    %263 = vector.broadcast %260 : vector<1x256xf32> to vector<64x256xf32>
    %264 = arith.addf %262, %263 : vector<64x256xf32>
    %c0_58 = arith.constant 0 : index
    %c0_59 = arith.constant 0 : index
    %265 = vector.load %arg8[%c0_58, %c0_59] : memref<64x256xf32, #tpu.memory_space<vmem>>, vector<64x256xf32>
    tpu.vector_store %arg8[%c0_58, %c0_59], %264 {strides = array<i32>} : memref<64x256xf32, #tpu.memory_space<vmem>>, vector<64x256xf32>,
    %cst_60 = arith.constant 0.000000e+00 : f32
    %266 = vector.broadcast %cst_60 : f32 to vector<8x64xf32>
    %cst_61 = arith.constant 0.000000e+00 : f32
    %267 = vector.broadcast %cst_61 : f32 to vector<8x64xf32>
    %c0_62 = arith.constant 0 : index
    %c0_63 = arith.constant 0 : index
    %268 = vector.load %arg8[%c0_62, %c0_63] : memref<64x256xf32, #tpu.memory_space<vmem>>, vector<8x128xf32>
    %c56_64 = arith.constant 56 : index
    %c128_65 = arith.constant 128 : index
    %269 = vector.load %arg8[%c56_64, %c128_65] : memref<64x256xf32, #tpu.memory_space<vmem>>, vector<8x128xf32>
    %270 = tpu.concatenate %268, %269 in 1 : vector<8x128xf32>, vector<8x128xf32> -> vector<8x256xf32>
    %cst_66 = arith.constant dense<0.000000e+00> : vector<8x256xf32>
    %271 = tpu.matmul %266, %261, %cst_66 {dimension_numbers = #tpu.dot_dimension_numbers<[1], [0], [0], [1], [0, 0, 1, 1], [], []>} : vector<8x64xf32>, vector<64x256xf32>, vector<8x256xf32> -> vector<8x256xf32>
    %272 = arith.addf %270, %271 : vector<8x256xf32>
    %273 = arith.negf %272 : vector<8x256xf32>
    %274 = math.exp %273 : vector<8x256xf32>
    %cst_67 = arith.constant 1.000000e+00 : f32
    %275 = vector.broadcast %cst_67 : f32 to vector<8x256xf32>
    %276 = arith.addf %275, %274 : vector<8x256xf32>
    %277 = arith.divf %275, %276 : vector<8x256xf32>
    %278 = vector.extract_strided_slice %277 {offsets = [0, 0], sizes = [8, 32], strides = [1, 1]} : vector<8x256xf32> to vector<8x32xf32>
    %279 = vector.extract_strided_slice %277 {offsets = [0, 128], sizes = [8, 32], strides = [1, 1]} : vector<8x256xf32> to vector<8x32xf32>
    %280 = tpu.concatenate %278, %279 in 1 : vector<8x32xf32>, vector<8x32xf32> -> vector<8x64xf32>
    %281 = vector.extract_strided_slice %277 {offsets = [0, 32], sizes = [8, 32], strides = [1, 1]} : vector<8x256xf32> to vector<8x32xf32>
    %282 = vector.extract_strided_slice %277 {offsets = [0, 160], sizes = [8, 32], strides = [1, 1]} : vector<8x256xf32> to vector<8x32xf32>
    %283 = tpu.concatenate %281, %282 in 1 : vector<8x32xf32>, vector<8x32xf32> -> vector<8x64xf32>
    %284 = vector.extract_strided_slice %277 {offsets = [0, 96], sizes = [8, 32], strides = [1, 1]} : vector<8x256xf32> to vector<8x32xf32>
    %285 = vector.extract_strided_slice %277 {offsets = [0, 224], sizes = [8, 32], strides = [1, 1]} : vector<8x256xf32> to vector<8x32xf32>
    %286 = tpu.concatenate %284, %285 in 1 : vector<8x32xf32>, vector<8x32xf32> -> vector<8x64xf32>
    %287 = vector.extract_strided_slice %272 {offsets = [0, 64], sizes = [8, 32], strides = [1, 1]} : vector<8x256xf32> to vector<8x32xf32>
    %288 = vector.extract_strided_slice %272 {offsets = [0, 192], sizes = [8, 32], strides = [1, 1]} : vector<8x256xf32> to vector<8x32xf32>
    %289 = tpu.concatenate %287, %288 in 1 : vector<8x32xf32>, vector<8x32xf32> -> vector<8x64xf32>
    %290 = math.tanh %289 : vector<8x64xf32>
    %291 = arith.mulf %283, %267 : vector<8x64xf32>
    %292 = arith.mulf %280, %290 : vector<8x64xf32>
    %293 = arith.addf %291, %292 : vector<8x64xf32>
    %294 = math.tanh %293 : vector<8x64xf32>
    %295 = arith.mulf %286, %294 : vector<8x64xf32>
    %296 = vector.extract_strided_slice %295 {offsets = [0, 0], sizes = [8, 32], strides = [1, 1]} : vector<8x64xf32> to vector<8x32xf32>
    %297 = vector.extract_strided_slice %295 {offsets = [0, 32], sizes = [8, 32], strides = [1, 1]} : vector<8x64xf32> to vector<8x32xf32>
    %c8_68 = arith.constant 8 : index
    %c0_69 = arith.constant 0 : index
    %298 = vector.load %arg8[%c8_68, %c0_69] : memref<64x256xf32, #tpu.memory_space<vmem>>, vector<8x128xf32>
    %c48_70 = arith.constant 48 : index
    %c128_71 = arith.constant 128 : index
    %299 = vector.load %arg8[%c48_70, %c128_71] : memref<64x256xf32, #tpu.memory_space<vmem>>, vector<8x128xf32>
    %300 = tpu.concatenate %298, %299 in 1 : vector<8x128xf32>, vector<8x128xf32> -> vector<8x256xf32>
    %cst_72 = arith.constant dense<0.000000e+00> : vector<8x256xf32>
    %301 = tpu.matmul %295, %261, %cst_72 {dimension_numbers = #tpu.dot_dimension_numbers<[1], [0], [0], [1], [0, 0, 1, 1], [], []>} : vector<8x64xf32>, vector<64x256xf32>, vector<8x256xf32> -> vector<8x256xf32>
    %302 = arith.addf %300, %301 : vector<8x256xf32>
    %303 = arith.negf %302 : vector<8x256xf32>
    %304 = math.exp %303 : vector<8x256xf32>
    %cst_73 = arith.constant 1.000000e+00 : f32
    %305 = vector.broadcast %cst_73 : f32 to vector<8x256xf32>
    %306 = arith.addf %305, %304 : vector<8x256xf32>
    %307 = arith.divf %305, %306 : vector<8x256xf32>
    %308 = vector.extract_strided_slice %307 {offsets = [0, 0], sizes = [8, 32], strides = [1, 1]} : vector<8x256xf32> to vector<8x32xf32>
    %309 = vector.extract_strided_slice %307 {offsets = [0, 128], sizes = [8, 32], strides = [1, 1]} : vector<8x256xf32> to vector<8x32xf32>
    %310 = tpu.concatenate %308, %309 in 1 : vector<8x32xf32>, vector<8x32xf32> -> vector<8x64xf32>
    %311 = vector.extract_strided_slice %307 {offsets = [0, 32], sizes = [8, 32], strides = [1, 1]} : vector<8x256xf32> to vector<8x32xf32>
    %312 = vector.extract_strided_slice %307 {offsets = [0, 160], sizes = [8, 32], strides = [1, 1]} : vector<8x256xf32> to vector<8x32xf32>
    %313 = tpu.concatenate %311, %312 in 1 : vector<8x32xf32>, vector<8x32xf32> -> vector<8x64xf32>
    %314 = vector.extract_strided_slice %307 {offsets = [0, 96], sizes = [8, 32], strides = [1, 1]} : vector<8x256xf32> to vector<8x32xf32>
    %315 = vector.extract_strided_slice %307 {offsets = [0, 224], sizes = [8, 32], strides = [1, 1]} : vector<8x256xf32> to vector<8x32xf32>
    %316 = tpu.concatenate %314, %315 in 1 : vector<8x32xf32>, vector<8x32xf32> -> vector<8x64xf32>
    %317 = vector.extract_strided_slice %302 {offsets = [0, 64], sizes = [8, 32], strides = [1, 1]} : vector<8x256xf32> to vector<8x32xf32>
    %318 = vector.extract_strided_slice %302 {offsets = [0, 192], sizes = [8, 32], strides = [1, 1]} : vector<8x256xf32> to vector<8x32xf32>
    %319 = tpu.concatenate %317, %318 in 1 : vector<8x32xf32>, vector<8x32xf32> -> vector<8x64xf32>
    %320 = math.tanh %319 : vector<8x64xf32>
    %321 = arith.mulf %313, %293 : vector<8x64xf32>
    %322 = arith.mulf %310, %320 : vector<8x64xf32>
    %323 = arith.addf %321, %322 : vector<8x64xf32>
    %324 = math.tanh %323 : vector<8x64xf32>
    %325 = arith.mulf %316, %324 : vector<8x64xf32>
    %326 = vector.extract_strided_slice %325 {offsets = [0, 0], sizes = [8, 32], strides = [1, 1]} : vector<8x64xf32> to vector<8x32xf32>
    %327 = vector.extract_strided_slice %325 {offsets = [0, 32], sizes = [8, 32], strides = [1, 1]} : vector<8x64xf32> to vector<8x32xf32>
    %c16_74 = arith.constant 16 : index
    %c0_75 = arith.constant 0 : index
    %328 = vector.load %arg8[%c16_74, %c0_75] : memref<64x256xf32, #tpu.memory_space<vmem>>, vector<8x128xf32>
    %c40_76 = arith.constant 40 : index
    %c128_77 = arith.constant 128 : index
    %329 = vector.load %arg8[%c40_76, %c128_77] : memref<64x256xf32, #tpu.memory_space<vmem>>, vector<8x128xf32>
    %330 = tpu.concatenate %328, %329 in 1 : vector<8x128xf32>, vector<8x128xf32> -> vector<8x256xf32>
    %cst_78 = arith.constant dense<0.000000e+00> : vector<8x256xf32>
    %331 = tpu.matmul %325, %261, %cst_78 {dimension_numbers = #tpu.dot_dimension_numbers<[1], [0], [0], [1], [0, 0, 1, 1], [], []>} : vector<8x64xf32>, vector<64x256xf32>, vector<8x256xf32> -> vector<8x256xf32>
    %332 = arith.addf %330, %331 : vector<8x256xf32>
    %333 = arith.negf %332 : vector<8x256xf32>
    %334 = math.exp %333 : vector<8x256xf32>
    %cst_79 = arith.constant 1.000000e+00 : f32
    %335 = vector.broadcast %cst_79 : f32 to vector<8x256xf32>
    %336 = arith.addf %335, %334 : vector<8x256xf32>
    %337 = arith.divf %335, %336 : vector<8x256xf32>
    %338 = vector.extract_strided_slice %337 {offsets = [0, 0], sizes = [8, 32], strides = [1, 1]} : vector<8x256xf32> to vector<8x32xf32>
    %339 = vector.extract_strided_slice %337 {offsets = [0, 128], sizes = [8, 32], strides = [1, 1]} : vector<8x256xf32> to vector<8x32xf32>
    %340 = tpu.concatenate %338, %339 in 1 : vector<8x32xf32>, vector<8x32xf32> -> vector<8x64xf32>
    %341 = vector.extract_strided_slice %337 {offsets = [0, 32], sizes = [8, 32], strides = [1, 1]} : vector<8x256xf32> to vector<8x32xf32>
    %342 = vector.extract_strided_slice %337 {offsets = [0, 160], sizes = [8, 32], strides = [1, 1]} : vector<8x256xf32> to vector<8x32xf32>
    %343 = tpu.concatenate %341, %342 in 1 : vector<8x32xf32>, vector<8x32xf32> -> vector<8x64xf32>
    %344 = vector.extract_strided_slice %337 {offsets = [0, 96], sizes = [8, 32], strides = [1, 1]} : vector<8x256xf32> to vector<8x32xf32>
    %345 = vector.extract_strided_slice %337 {offsets = [0, 224], sizes = [8, 32], strides = [1, 1]} : vector<8x256xf32> to vector<8x32xf32>
    %346 = tpu.concatenate %344, %345 in 1 : vector<8x32xf32>, vector<8x32xf32> -> vector<8x64xf32>
    %347 = vector.extract_strided_slice %332 {offsets = [0, 64], sizes = [8, 32], strides = [1, 1]} : vector<8x256xf32> to vector<8x32xf32>
    %348 = vector.extract_strided_slice %332 {offsets = [0, 192], sizes = [8, 32], strides = [1, 1]} : vector<8x256xf32> to vector<8x32xf32>
    %349 = tpu.concatenate %347, %348 in 1 : vector<8x32xf32>, vector<8x32xf32> -> vector<8x64xf32>
    %350 = math.tanh %349 : vector<8x64xf32>
    %351 = arith.mulf %343, %323 : vector<8x64xf32>
    %352 = arith.mulf %340, %350 : vector<8x64xf32>
    %353 = arith.addf %351, %352 : vector<8x64xf32>
    %354 = math.tanh %353 : vector<8x64xf32>
    %355 = arith.mulf %346, %354 : vector<8x64xf32>
    %356 = vector.extract_strided_slice %355 {offsets = [0, 0], sizes = [8, 32], strides = [1, 1]} : vector<8x64xf32> to vector<8x32xf32>
    %357 = vector.extract_strided_slice %355 {offsets = [0, 32], sizes = [8, 32], strides = [1, 1]} : vector<8x64xf32> to vector<8x32xf32>
    %c24_80 = arith.constant 24 : index
    %c0_81 = arith.constant 0 : index
    %358 = vector.load %arg8[%c24_80, %c0_81] : memref<64x256xf32, #tpu.memory_space<vmem>>, vector<8x128xf32>
    %c32_82 = arith.constant 32 : index
    %c128_83 = arith.constant 128 : index
    %359 = vector.load %arg8[%c32_82, %c128_83] : memref<64x256xf32, #tpu.memory_space<vmem>>, vector<8x128xf32>
    %360 = tpu.concatenate %358, %359 in 1 : vector<8x128xf32>, vector<8x128xf32> -> vector<8x256xf32>
    %cst_84 = arith.constant dense<0.000000e+00> : vector<8x256xf32>
    %361 = tpu.matmul %355, %261, %cst_84 {dimension_numbers = #tpu.dot_dimension_numbers<[1], [0], [0], [1], [0, 0, 1, 1], [], []>} : vector<8x64xf32>, vector<64x256xf32>, vector<8x256xf32> -> vector<8x256xf32>
    %362 = arith.addf %360, %361 : vector<8x256xf32>
    %363 = arith.negf %362 : vector<8x256xf32>
    %364 = math.exp %363 : vector<8x256xf32>
    %cst_85 = arith.constant 1.000000e+00 : f32
    %365 = vector.broadcast %cst_85 : f32 to vector<8x256xf32>
    %366 = arith.addf %365, %364 : vector<8x256xf32>
    %367 = arith.divf %365, %366 : vector<8x256xf32>
    %368 = vector.extract_strided_slice %367 {offsets = [0, 0], sizes = [8, 32], strides = [1, 1]} : vector<8x256xf32> to vector<8x32xf32>
    %369 = vector.extract_strided_slice %367 {offsets = [0, 128], sizes = [8, 32], strides = [1, 1]} : vector<8x256xf32> to vector<8x32xf32>
    %370 = tpu.concatenate %368, %369 in 1 : vector<8x32xf32>, vector<8x32xf32> -> vector<8x64xf32>
    %371 = vector.extract_strided_slice %367 {offsets = [0, 32], sizes = [8, 32], strides = [1, 1]} : vector<8x256xf32> to vector<8x32xf32>
    %372 = vector.extract_strided_slice %367 {offsets = [0, 160], sizes = [8, 32], strides = [1, 1]} : vector<8x256xf32> to vector<8x32xf32>
    %373 = tpu.concatenate %371, %372 in 1 : vector<8x32xf32>, vector<8x32xf32> -> vector<8x64xf32>
    %374 = vector.extract_strided_slice %367 {offsets = [0, 96], sizes = [8, 32], strides = [1, 1]} : vector<8x256xf32> to vector<8x32xf32>
    %375 = vector.extract_strided_slice %367 {offsets = [0, 224], sizes = [8, 32], strides = [1, 1]} : vector<8x256xf32> to vector<8x32xf32>
    %376 = tpu.concatenate %374, %375 in 1 : vector<8x32xf32>, vector<8x32xf32> -> vector<8x64xf32>
    %377 = vector.extract_strided_slice %362 {offsets = [0, 64], sizes = [8, 32], strides = [1, 1]} : vector<8x256xf32> to vector<8x32xf32>
    %378 = vector.extract_strided_slice %362 {offsets = [0, 192], sizes = [8, 32], strides = [1, 1]} : vector<8x256xf32> to vector<8x32xf32>
    %379 = tpu.concatenate %377, %378 in 1 : vector<8x32xf32>, vector<8x32xf32> -> vector<8x64xf32>
    %380 = math.tanh %379 : vector<8x64xf32>
    %381 = arith.mulf %373, %353 : vector<8x64xf32>
    %382 = arith.mulf %370, %380 : vector<8x64xf32>
    %383 = arith.addf %381, %382 : vector<8x64xf32>
    %384 = math.tanh %383 : vector<8x64xf32>
    %385 = arith.mulf %376, %384 : vector<8x64xf32>
    %386 = vector.extract_strided_slice %385 {offsets = [0, 0], sizes = [8, 32], strides = [1, 1]} : vector<8x64xf32> to vector<8x32xf32>
    %387 = vector.extract_strided_slice %385 {offsets = [0, 32], sizes = [8, 32], strides = [1, 1]} : vector<8x64xf32> to vector<8x32xf32>
    %c32_86 = arith.constant 32 : index
    %c0_87 = arith.constant 0 : index
    %388 = vector.load %arg8[%c32_86, %c0_87] : memref<64x256xf32, #tpu.memory_space<vmem>>, vector<8x128xf32>
    %c24_88 = arith.constant 24 : index
    %c128_89 = arith.constant 128 : index
    %389 = vector.load %arg8[%c24_88, %c128_89] : memref<64x256xf32, #tpu.memory_space<vmem>>, vector<8x128xf32>
    %390 = tpu.concatenate %388, %389 in 1 : vector<8x128xf32>, vector<8x128xf32> -> vector<8x256xf32>
    %cst_90 = arith.constant dense<0.000000e+00> : vector<8x256xf32>
    %391 = tpu.matmul %385, %261, %cst_90 {dimension_numbers = #tpu.dot_dimension_numbers<[1], [0], [0], [1], [0, 0, 1, 1], [], []>} : vector<8x64xf32>, vector<64x256xf32>, vector<8x256xf32> -> vector<8x256xf32>
    %392 = arith.addf %390, %391 : vector<8x256xf32>
    %393 = arith.negf %392 : vector<8x256xf32>
    %394 = math.exp %393 : vector<8x256xf32>
    %cst_91 = arith.constant 1.000000e+00 : f32
    %395 = vector.broadcast %cst_91 : f32 to vector<8x256xf32>
    %396 = arith.addf %395, %394 : vector<8x256xf32>
    %397 = arith.divf %395, %396 : vector<8x256xf32>
    %398 = vector.extract_strided_slice %397 {offsets = [0, 0], sizes = [8, 32], strides = [1, 1]} : vector<8x256xf32> to vector<8x32xf32>
    %399 = vector.extract_strided_slice %397 {offsets = [0, 128], sizes = [8, 32], strides = [1, 1]} : vector<8x256xf32> to vector<8x32xf32>
    %400 = tpu.concatenate %398, %399 in 1 : vector<8x32xf32>, vector<8x32xf32> -> vector<8x64xf32>
    %401 = vector.extract_strided_slice %397 {offsets = [0, 32], sizes = [8, 32], strides = [1, 1]} : vector<8x256xf32> to vector<8x32xf32>
    %402 = vector.extract_strided_slice %397 {offsets = [0, 160], sizes = [8, 32], strides = [1, 1]} : vector<8x256xf32> to vector<8x32xf32>
    %403 = tpu.concatenate %401, %402 in 1 : vector<8x32xf32>, vector<8x32xf32> -> vector<8x64xf32>
    %404 = vector.extract_strided_slice %397 {offsets = [0, 96], sizes = [8, 32], strides = [1, 1]} : vector<8x256xf32> to vector<8x32xf32>
    %405 = vector.extract_strided_slice %397 {offsets = [0, 224], sizes = [8, 32], strides = [1, 1]} : vector<8x256xf32> to vector<8x32xf32>
    %406 = tpu.concatenate %404, %405 in 1 : vector<8x32xf32>, vector<8x32xf32> -> vector<8x64xf32>
    %407 = vector.extract_strided_slice %392 {offsets = [0, 64], sizes = [8, 32], strides = [1, 1]} : vector<8x256xf32> to vector<8x32xf32>
    %408 = vector.extract_strided_slice %392 {offsets = [0, 192], sizes = [8, 32], strides = [1, 1]} : vector<8x256xf32> to vector<8x32xf32>
    %409 = tpu.concatenate %407, %408 in 1 : vector<8x32xf32>, vector<8x32xf32> -> vector<8x64xf32>
    %410 = math.tanh %409 : vector<8x64xf32>
    %411 = arith.mulf %403, %383 : vector<8x64xf32>
    %412 = arith.mulf %400, %410 : vector<8x64xf32>
    %413 = arith.addf %411, %412 : vector<8x64xf32>
    %414 = math.tanh %413 : vector<8x64xf32>
    %415 = arith.mulf %406, %414 : vector<8x64xf32>
    %416 = vector.extract_strided_slice %415 {offsets = [0, 0], sizes = [8, 32], strides = [1, 1]} : vector<8x64xf32> to vector<8x32xf32>
    %417 = vector.extract_strided_slice %415 {offsets = [0, 32], sizes = [8, 32], strides = [1, 1]} : vector<8x64xf32> to vector<8x32xf32>
    %c40_92 = arith.constant 40 : index
    %c0_93 = arith.constant 0 : index
    %418 = vector.load %arg8[%c40_92, %c0_93] : memref<64x256xf32, #tpu.memory_space<vmem>>, vector<8x128xf32>
    %c16_94 = arith.constant 16 : index
    %c128_95 = arith.constant 128 : index
    %419 = vector.load %arg8[%c16_94, %c128_95] : memref<64x256xf32, #tpu.memory_space<vmem>>, vector<8x128xf32>
    %420 = tpu.concatenate %418, %419 in 1 : vector<8x128xf32>, vector<8x128xf32> -> vector<8x256xf32>
    %cst_96 = arith.constant dense<0.000000e+00> : vector<8x256xf32>
    %421 = tpu.matmul %415, %261, %cst_96 {dimension_numbers = #tpu.dot_dimension_numbers<[1], [0], [0], [1], [0, 0, 1, 1], [], []>} : vector<8x64xf32>, vector<64x256xf32>, vector<8x256xf32> -> vector<8x256xf32>
    %422 = arith.addf %420, %421 : vector<8x256xf32>
    %423 = arith.negf %422 : vector<8x256xf32>
    %424 = math.exp %423 : vector<8x256xf32>
    %cst_97 = arith.constant 1.000000e+00 : f32
    %425 = vector.broadcast %cst_97 : f32 to vector<8x256xf32>
    %426 = arith.addf %425, %424 : vector<8x256xf32>
    %427 = arith.divf %425, %426 : vector<8x256xf32>
    %428 = vector.extract_strided_slice %427 {offsets = [0, 0], sizes = [8, 32], strides = [1, 1]} : vector<8x256xf32> to vector<8x32xf32>
    %429 = vector.extract_strided_slice %427 {offsets = [0, 128], sizes = [8, 32], strides = [1, 1]} : vector<8x256xf32> to vector<8x32xf32>
    %430 = tpu.concatenate %428, %429 in 1 : vector<8x32xf32>, vector<8x32xf32> -> vector<8x64xf32>
    %431 = vector.extract_strided_slice %427 {offsets = [0, 32], sizes = [8, 32], strides = [1, 1]} : vector<8x256xf32> to vector<8x32xf32>
    %432 = vector.extract_strided_slice %427 {offsets = [0, 160], sizes = [8, 32], strides = [1, 1]} : vector<8x256xf32> to vector<8x32xf32>
    %433 = tpu.concatenate %431, %432 in 1 : vector<8x32xf32>, vector<8x32xf32> -> vector<8x64xf32>
    %434 = vector.extract_strided_slice %427 {offsets = [0, 96], sizes = [8, 32], strides = [1, 1]} : vector<8x256xf32> to vector<8x32xf32>
    %435 = vector.extract_strided_slice %427 {offsets = [0, 224], sizes = [8, 32], strides = [1, 1]} : vector<8x256xf32> to vector<8x32xf32>
    %436 = tpu.concatenate %434, %435 in 1 : vector<8x32xf32>, vector<8x32xf32> -> vector<8x64xf32>
    %437 = vector.extract_strided_slice %422 {offsets = [0, 64], sizes = [8, 32], strides = [1, 1]} : vector<8x256xf32> to vector<8x32xf32>
    %438 = vector.extract_strided_slice %422 {offsets = [0, 192], sizes = [8, 32], strides = [1, 1]} : vector<8x256xf32> to vector<8x32xf32>
    %439 = tpu.concatenate %437, %438 in 1 : vector<8x32xf32>, vector<8x32xf32> -> vector<8x64xf32>
    %440 = math.tanh %439 : vector<8x64xf32>
    %441 = arith.mulf %433, %413 : vector<8x64xf32>
    %442 = arith.mulf %430, %440 : vector<8x64xf32>
    %443 = arith.addf %441, %442 : vector<8x64xf32>
    %444 = math.tanh %443 : vector<8x64xf32>
    %445 = arith.mulf %436, %444 : vector<8x64xf32>
    %446 = vector.extract_strided_slice %445 {offsets = [0, 0], sizes = [8, 32], strides = [1, 1]} : vector<8x64xf32> to vector<8x32xf32>
    %447 = vector.extract_strided_slice %445 {offsets = [0, 32], sizes = [8, 32], strides = [1, 1]} : vector<8x64xf32> to vector<8x32xf32>
    %c48_98 = arith.constant 48 : index
    %c0_99 = arith.constant 0 : index
    %448 = vector.load %arg8[%c48_98, %c0_99] : memref<64x256xf32, #tpu.memory_space<vmem>>, vector<8x128xf32>
    %c8_100 = arith.constant 8 : index
    %c128_101 = arith.constant 128 : index
    %449 = vector.load %arg8[%c8_100, %c128_101] : memref<64x256xf32, #tpu.memory_space<vmem>>, vector<8x128xf32>
    %450 = tpu.concatenate %448, %449 in 1 : vector<8x128xf32>, vector<8x128xf32> -> vector<8x256xf32>
    %cst_102 = arith.constant dense<0.000000e+00> : vector<8x256xf32>
    %451 = tpu.matmul %445, %261, %cst_102 {dimension_numbers = #tpu.dot_dimension_numbers<[1], [0], [0], [1], [0, 0, 1, 1], [], []>} : vector<8x64xf32>, vector<64x256xf32>, vector<8x256xf32> -> vector<8x256xf32>
    %452 = arith.addf %450, %451 : vector<8x256xf32>
    %453 = arith.negf %452 : vector<8x256xf32>
    %454 = math.exp %453 : vector<8x256xf32>
    %cst_103 = arith.constant 1.000000e+00 : f32
    %455 = vector.broadcast %cst_103 : f32 to vector<8x256xf32>
    %456 = arith.addf %455, %454 : vector<8x256xf32>
    %457 = arith.divf %455, %456 : vector<8x256xf32>
    %458 = vector.extract_strided_slice %457 {offsets = [0, 0], sizes = [8, 32], strides = [1, 1]} : vector<8x256xf32> to vector<8x32xf32>
    %459 = vector.extract_strided_slice %457 {offsets = [0, 128], sizes = [8, 32], strides = [1, 1]} : vector<8x256xf32> to vector<8x32xf32>
    %460 = tpu.concatenate %458, %459 in 1 : vector<8x32xf32>, vector<8x32xf32> -> vector<8x64xf32>
    %461 = vector.extract_strided_slice %457 {offsets = [0, 32], sizes = [8, 32], strides = [1, 1]} : vector<8x256xf32> to vector<8x32xf32>
    %462 = vector.extract_strided_slice %457 {offsets = [0, 160], sizes = [8, 32], strides = [1, 1]} : vector<8x256xf32> to vector<8x32xf32>
    %463 = tpu.concatenate %461, %462 in 1 : vector<8x32xf32>, vector<8x32xf32> -> vector<8x64xf32>
    %464 = vector.extract_strided_slice %457 {offsets = [0, 96], sizes = [8, 32], strides = [1, 1]} : vector<8x256xf32> to vector<8x32xf32>
    %465 = vector.extract_strided_slice %457 {offsets = [0, 224], sizes = [8, 32], strides = [1, 1]} : vector<8x256xf32> to vector<8x32xf32>
    %466 = tpu.concatenate %464, %465 in 1 : vector<8x32xf32>, vector<8x32xf32> -> vector<8x64xf32>
    %467 = vector.extract_strided_slice %452 {offsets = [0, 64], sizes = [8, 32], strides = [1, 1]} : vector<8x256xf32> to vector<8x32xf32>
    %468 = vector.extract_strided_slice %452 {offsets = [0, 192], sizes = [8, 32], strides = [1, 1]} : vector<8x256xf32> to vector<8x32xf32>
    %469 = tpu.concatenate %467, %468 in 1 : vector<8x32xf32>, vector<8x32xf32> -> vector<8x64xf32>
    %470 = math.tanh %469 : vector<8x64xf32>
    %471 = arith.mulf %463, %443 : vector<8x64xf32>
    %472 = arith.mulf %460, %470 : vector<8x64xf32>
    %473 = arith.addf %471, %472 : vector<8x64xf32>
    %474 = math.tanh %473 : vector<8x64xf32>
    %475 = arith.mulf %466, %474 : vector<8x64xf32>
    %476 = vector.extract_strided_slice %475 {offsets = [0, 0], sizes = [8, 32], strides = [1, 1]} : vector<8x64xf32> to vector<8x32xf32>
    %477 = vector.extract_strided_slice %475 {offsets = [0, 32], sizes = [8, 32], strides = [1, 1]} : vector<8x64xf32> to vector<8x32xf32>
    %c56_104 = arith.constant 56 : index
    %c0_105 = arith.constant 0 : index
    %478 = vector.load %arg8[%c56_104, %c0_105] : memref<64x256xf32, #tpu.memory_space<vmem>>, vector<8x128xf32>
    %c0_106 = arith.constant 0 : index
    %c128_107 = arith.constant 128 : index
    %479 = vector.load %arg8[%c0_106, %c128_107] : memref<64x256xf32, #tpu.memory_space<vmem>>, vector<8x128xf32>
    %480 = tpu.concatenate %478, %479 in 1 : vector<8x128xf32>, vector<8x128xf32> -> vector<8x256xf32>
    %cst_108 = arith.constant dense<0.000000e+00> : vector<8x256xf32>
    %481 = tpu.matmul %475, %261, %cst_108 {dimension_numbers = #tpu.dot_dimension_numbers<[1], [0], [0], [1], [0, 0, 1, 1], [], []>} : vector<8x64xf32>, vector<64x256xf32>, vector<8x256xf32> -> vector<8x256xf32>
    %482 = arith.addf %480, %481 : vector<8x256xf32>
    %483 = arith.negf %482 : vector<8x256xf32>
    %484 = math.exp %483 : vector<8x256xf32>
    %cst_109 = arith.constant 1.000000e+00 : f32
    %485 = vector.broadcast %cst_109 : f32 to vector<8x256xf32>
    %486 = arith.addf %485, %484 : vector<8x256xf32>
    %487 = arith.divf %485, %486 : vector<8x256xf32>
    %488 = vector.extract_strided_slice %487 {offsets = [0, 0], sizes = [8, 32], strides = [1, 1]} : vector<8x256xf32> to vector<8x32xf32>
    %489 = vector.extract_strided_slice %487 {offsets = [0, 128], sizes = [8, 32], strides = [1, 1]} : vector<8x256xf32> to vector<8x32xf32>
    %490 = tpu.concatenate %488, %489 in 1 : vector<8x32xf32>, vector<8x32xf32> -> vector<8x64xf32>
    %491 = vector.extract_strided_slice %487 {offsets = [0, 32], sizes = [8, 32], strides = [1, 1]} : vector<8x256xf32> to vector<8x32xf32>
    %492 = vector.extract_strided_slice %487 {offsets = [0, 160], sizes = [8, 32], strides = [1, 1]} : vector<8x256xf32> to vector<8x32xf32>
    %493 = tpu.concatenate %491, %492 in 1 : vector<8x32xf32>, vector<8x32xf32> -> vector<8x64xf32>
    %494 = vector.extract_strided_slice %487 {offsets = [0, 96], sizes = [8, 32], strides = [1, 1]} : vector<8x256xf32> to vector<8x32xf32>
    %495 = vector.extract_strided_slice %487 {offsets = [0, 224], sizes = [8, 32], strides = [1, 1]} : vector<8x256xf32> to vector<8x32xf32>
    %496 = tpu.concatenate %494, %495 in 1 : vector<8x32xf32>, vector<8x32xf32> -> vector<8x64xf32>
    %497 = vector.extract_strided_slice %482 {offsets = [0, 64], sizes = [8, 32], strides = [1, 1]} : vector<8x256xf32> to vector<8x32xf32>
    %498 = vector.extract_strided_slice %482 {offsets = [0, 192], sizes = [8, 32], strides = [1, 1]} : vector<8x256xf32> to vector<8x32xf32>
    %499 = tpu.concatenate %497, %498 in 1 : vector<8x32xf32>, vector<8x32xf32> -> vector<8x64xf32>
    %500 = math.tanh %499 : vector<8x64xf32>
    %501 = arith.mulf %493, %473 : vector<8x64xf32>
    %502 = arith.mulf %490, %500 : vector<8x64xf32>
    %503 = arith.addf %501, %502 : vector<8x64xf32>
    %504 = math.tanh %503 : vector<8x64xf32>
    %505 = arith.mulf %496, %504 : vector<8x64xf32>
    %506 = vector.extract_strided_slice %505 {offsets = [0, 0], sizes = [8, 32], strides = [1, 1]} : vector<8x64xf32> to vector<8x32xf32>
    %507 = vector.extract_strided_slice %505 {offsets = [0, 32], sizes = [8, 32], strides = [1, 1]} : vector<8x64xf32> to vector<8x32xf32>
    %508 = tpu.concatenate %296, %507 in 1 : vector<8x32xf32>, vector<8x32xf32> -> vector<8x64xf32>
    %509 = tpu.concatenate %326, %477 in 1 : vector<8x32xf32>, vector<8x32xf32> -> vector<8x64xf32>
    %510 = tpu.concatenate %356, %447 in 1 : vector<8x32xf32>, vector<8x32xf32> -> vector<8x64xf32>
    %511 = tpu.concatenate %386, %417 in 1 : vector<8x32xf32>, vector<8x32xf32> -> vector<8x64xf32>
    %512 = tpu.concatenate %416, %387 in 1 : vector<8x32xf32>, vector<8x32xf32> -> vector<8x64xf32>
    %513 = tpu.concatenate %446, %357 in 1 : vector<8x32xf32>, vector<8x32xf32> -> vector<8x64xf32>
    %514 = tpu.concatenate %476, %327 in 1 : vector<8x32xf32>, vector<8x32xf32> -> vector<8x64xf32>
    %515 = tpu.concatenate %506, %297 in 1 : vector<8x32xf32>, vector<8x32xf32> -> vector<8x64xf32>
    %516 = tpu.concatenate %508, %509, %510, %511, %512, %513, %514, %515 in 0 : vector<8x64xf32>, vector<8x64xf32>, vector<8x64xf32>, vector<8x64xf32>, vector<8x64xf32>, vector<8x64xf32>, vector<8x64xf32>, vector<8x64xf32> -> vector<64x64xf32>
    %c0_110 = arith.constant 0 : index
    %c0_111 = arith.constant 0 : index
    %517 = vector.load %arg7[%c0_110, %c0_111] : memref<64x64xf32, #tpu.memory_space<vmem>>, vector<64x64xf32>
    tpu.vector_store %arg7[%c0_110, %c0_111], %516 {strides = array<i32>} : memref<64x64xf32, #tpu.memory_space<vmem>>, vector<64x64xf32>,
    return
  }
}

</mosaic_0001>

<bundles_post_ra>
// kernel: lstm_decoder_forward.1
= control target key start
LH: loop header
LB: loop body
LE: loop exit
PB: predicated region body
PF: predicated region fallthrough
CT: control target
= control target key end

     0   :  { %v2665_v3 = vmov 0.0   ;;  %vm78_vm0 = vcmask 523264   ;;  %v68_v41 = vlaneseq  ;;  %s2668_s12 = smov 32   ;;  %vm326_vm1 = vcmask 261120   ;;  %s3677_s1 = inlined_call_operand.vmem [shape: f32[64,256], index: 1, kind: input, shape index: {}]   ;;  %s3678_s3 = inlined_call_operand.vmem [shape: f32[64,256], index: 3, kind: input, shape index: {}]   ;;  %s3679_s0 = inlined_call_operand.vmem [shape: f32[64,64], index: 0, kind: input, shape index: {}]   ;;  %s3680_s2 = inlined_call_operand.vmem [shape: f32[1,256], index: 2, kind: input, shape index: {}]   ;;  %s3681_s4 = inlined_call_operand.vmem [shape: f32[64,256], index: 4, kind: input, shape index: {}]   ;;  %s3682_s6 = inlined_call_operand.vmem [shape: f32[64,256], index: 6, kind: input, shape index: {}]   ;;  %s3683_s5 = inlined_call_operand.vmem [shape: f32[1,256], index: 5, kind: input, shape index: {}]   ;;  %s3684_s7 = inlined_call_operand.vmem [shape: f32[64,64], index: 7, kind: output, shape index: {}]  }
   0x1   :  { %v49_v0 = vld [vmem:[%s3677_s1 + $0x78] sm:$0xff]  ;;  %v48_v1 = vld [vmem:[%s3677_s1 + $0x70] sm:$0xff]  ;;  %v47_v2 = vld [vmem:[%s3677_s1 + $0x68] sm:$0xff]  ;;  %167 = vmatprep.mubr.f32.mxu0 %v2665_v3  ;;  %301 = vmatprep.mubr.f32.mxu1 %v2665_v3 }
   0x2   :  { %119 = vmatprep.subr.mxu0 %v49_v0  ;;  %v2723_v4 = vld [vmem:[%s3678_s3 + $0x78] sm:$0xff]  ;;  %v46_v5 = vld [vmem:[%s3677_s1 + $0x60] sm:$0xff]  ;;  %v2731_v6 = vld [vmem:[%s3678_s3 + $0x70] sm:$0xff]  ;;  %v2931_v42 = vshrl.u32 %v68_v41, 7 }
   0x3   :  { %120 = vmatpush1.msra.mxu0 %v48_v1  ;;  %253 = vmatprep.subr.mxu1 %v2723_v4  ;;  %v45_v7 = vld [vmem:[%s3677_s1 + $0x58] sm:$0xff]  ;;  %v2740_v8 = vld [vmem:[%s3678_s3 + $0x68] sm:$0xff]  ;;  %v44_v9 = vld [vmem:[%s3677_s1 + $0x50] sm:$0xff] }
   0x4   :  { %121 = vmatprep.subr.mxu0 %v47_v2  ;;  %254 = vmatpush1.msra.mxu1 %v2731_v6  ;;  %v2749_v10 = vld [vmem:[%s3678_s3 + $0x60] sm:$0xff]  ;;  %v2754_v11 = vld [vmem:[%s3678_s3 + $0x58] sm:$0xff]  ;;  %v43_v12 = vld [vmem:[%s3677_s1 + $0x48] sm:$0xff]  ;;  %v70_v43 = vsub.s32 0, %v2931_v42  ;;  %v74_v45 = vsub.s32 1, %v2931_v42 }
   0x5   :  { %122 = vmatpush1.msra.mxu0 %v46_v5  ;;  %255 = vmatprep.subr.mxu1 %v2740_v8  ;;  %v2763_v13 = vld [vmem:[%s3678_s3 + $0x50] sm:$0xff]  ;;  %v42_v14 = vld [vmem:[%s3677_s1 + $0x40] sm:$0xff]  ;;  %v2772_v15 = vld [vmem:[%s3678_s3 + $0x48] sm:$0xff] }
   0x6   :  { %123 = vmatprep.subr.mxu0 %v45_v7  ;;  %256 = vmatpush1.msra.mxu1 %v2749_v10  ;;  %v41_v16 = vld [vmem:[%s3677_s1 + $0x38] sm:$0xff]  ;;  %v2781_v17 = vld [vmem:[%s3678_s3 + $0x40] sm:$0xff]  ;;  %v40_v18 = vld [vmem:[%s3677_s1 + $0x30] sm:$0xff] }
   0x7   :  { %124 = vmatpush1.msra.mxu0 %v44_v9  ;;  %257 = vmatprep.subr.mxu1 %v2754_v11  ;;  %v2790_v19 = vld [vmem:[%s3678_s3 + $0x38] sm:$0xff]  ;;  %v39_v20 = vld [vmem:[%s3677_s1 + $0x28] sm:$0xff]  ;;  %v2799_v21 = vld [vmem:[%s3678_s3 + $0x30] sm:$0xff] }
   0x8   :  { %125 = vmatprep.subr.mxu0 %v43_v12  ;;  %258 = vmatpush1.msra.mxu1 %v2763_v13  ;;  %v38_v22 = vld [vmem:[%s3677_s1 + $0x20] sm:$0xff]  ;;  %v2808_v23 = vld [vmem:[%s3678_s3 + $0x28] sm:$0xff]  ;;  %v37_v24 = vld [vmem:[%s3677_s1 + $0x18] sm:$0xff] }
   0x9   :  { %126 = vmatpush1.msra.mxu0 %v42_v14  ;;  %259 = vmatprep.subr.mxu1 %v2772_v15  ;;  %v2817_v25 = vld [vmem:[%s3678_s3 + $0x20] sm:$0xff]  ;;  %v36_v26 = vld [vmem:[%s3677_s1 + $0x10] sm:$0xff]  ;;  %v2826_v27 = vld [vmem:[%s3678_s3 + $0x18] sm:$0xff] }
   0xa   :  { %127 = vmatprep.subr.mxu0 %v41_v16  ;;  %260 = vmatpush1.msra.mxu1 %v2781_v17  ;;  %v35_v28 = vld [vmem:[%s3677_s1 + $0x8] sm:$0xff]  ;;  %v2835_v29 = vld [vmem:[%s3678_s3 + $0x10] sm:$0xff]  ;;  %v34_v30 = vld [vmem:[%s3677_s1] sm:$0xff] }
   0xb   :  { %128 = vmatpush1.msra.mxu0 %v40_v18  ;;  %261 = vmatprep.subr.mxu1 %v2790_v19  ;;  %v2844_v31 = vld [vmem:[%s3678_s3 + $0x8] sm:$0xff]  ;;  %v26_v32 = vld [vmem:[%s3679_s0] sm:$0xff]  ;;  %v28_v35 = vld [vmem:[%s3679_s0 + $0x10] sm:$0xff] }
   0xc   :  { %129 = vmatprep.subr.mxu0 %v39_v20  ;;  %262 = vmatpush1.msra.mxu1 %v2799_v21  ;;  %v2853_v33 = vld [vmem:[%s3678_s3] sm:$0xff]  ;;  %v27_v34 = vld [vmem:[%s3679_s0 + $0x8] sm:$0xff]  ;;  %v29_v36 = vld [vmem:[%s3679_s0 + $0x18] sm:$0xff] }
   0xd   :  { %130 = vmatpush1.msra.mxu0 %v38_v22  ;;  %263 = vmatprep.subr.mxu1 %v2808_v23  ;;  %v30_v37 = vld [vmem:[%s3679_s0 + $0x20] sm:$0xff]  ;;  %v31_v38 = vld [vmem:[%s3679_s0 + $0x28] sm:$0xff]  ;;  %v32_v39 = vld [vmem:[%s3679_s0 + $0x30] sm:$0xff] }
   0xe   :  { %131 = vmatprep.subr.mxu0 %v37_v24  ;;  %264 = vmatpush1.msra.mxu1 %v2817_v25  ;;  %v33_v40 = vld [vmem:[%s3679_s0 + $0x38] sm:$0xff]  ;;  %v50_v44 = vld [vmem:[%s3680_s2] sm:$0x3]  ;;  %s2666_s0 = smov 64   ;;  %s2667_s2 = smov 96  }
   0xf   :  { %132 = vmatpush1.msra.mxu0 %v36_v26  ;;  %265 = vmatprep.subr.mxu1 %v2826_v27  ;;  %v71_v46 = vrot.slane %v50_v44, %v70_v43  ;;  %v75_v47 = vrot.slane %v50_v44, %v74_v45 }
  0x10   :  { %133 = vmatprep.subr.mxu0 %v35_v28  ;;  %266 = vmatpush1.msra.mxu1 %v2835_v29 }
  0x11   :  { %134 = vmatpush1.msra.mxu0 %v34_v30  ;;  %267 = vmatprep.subr.mxu1 %v2844_v31 }
  0x12   :  { %2407 = vmatmul.mubr.msk.f32.vlgmr.msra.gmra.mxu0 %vm78_vm0, %v26_v32  ;;  %268 = vmatpush1.msra.mxu1 %v2853_v33 }
  0x13   :  { %302 = vmatmul.mubr.f32.vlgmr.msra.gmra.mxu1 %v2665_v3  ;;  %173 = vmatprep.mubr.f32.mxu0 %v2665_v3 }
  0x14   :  { %376 = vmatprep.subr.mxu1 %v2723_v4  ;;  %424 = vmatprep.mubr.f32.mxu1 %v2665_v3 }
  0x15   :  { %377 = vmatpush1.msra.mxu1 %v2731_v6  ;;  %498 = vmatprep.subr.mxu0 %v2723_v4 }
  0x16   :  { %2408 = vmatmul.mubr.msk.f32.gmra.mxu0 %vm78_vm0, %v27_v34  ;;  %378 = vmatprep.subr.mxu1 %v2740_v8 }
  0x17   :  { %179 = vmatprep.mubr.f32.mxu0 %v2665_v3  ;;  %379 = vmatpush1.msra.mxu1 %v2749_v10 }
  0x18   :  { %380 = vmatprep.subr.mxu1 %v2754_v11  ;;  %499 = vmatpush1.msra.mxu0 %v2731_v6 }
  0x19   :  { %381 = vmatpush1.msra.mxu1 %v2763_v13  ;;  %500 = vmatprep.subr.mxu0 %v2740_v8 }
  0x1a   :  { %2409 = vmatmul.mubr.msk.f32.gmra.mxu0 %vm78_vm0, %v28_v35  ;;  %382 = vmatprep.subr.mxu1 %v2772_v15 }
  0x1b   :  { %185 = vmatprep.mubr.f32.mxu0 %v2665_v3  ;;  %383 = vmatpush1.msra.mxu1 %v2781_v17 }
  0x1c   :  { %384 = vmatprep.subr.mxu1 %v2790_v19  ;;  %501 = vmatpush1.msra.mxu0 %v2749_v10 }
  0x1d   :  { %385 = vmatpush1.msra.mxu1 %v2799_v21  ;;  %502 = vmatprep.subr.mxu0 %v2754_v11 }
  0x1e   :  { %2410 = vmatmul.mubr.msk.f32.gmra.mxu0 %vm78_vm0, %v29_v36  ;;  %386 = vmatprep.subr.mxu1 %v2808_v23 }
  0x1f   :  { %191 = vmatprep.mubr.f32.mxu0 %v2665_v3  ;;  %387 = vmatpush1.msra.mxu1 %v2817_v25 }
  0x20   :  { %388 = vmatprep.subr.mxu1 %v2826_v27  ;;  %503 = vmatpush1.msra.mxu0 %v2763_v13 }
  0x21   :  { %389 = vmatpush1.msra.mxu1 %v2835_v29  ;;  %504 = vmatprep.subr.mxu0 %v2772_v15 }
  0x22   :  { %2411 = vmatmul.mubr.msk.f32.gmra.mxu0 %vm78_vm0, %v30_v37  ;;  %390 = vmatprep.subr.mxu1 %v2844_v31 }
  0x23   :  { %197 = vmatprep.mubr.f32.mxu0 %v2665_v3  ;;  %391 = vmatpush1.msra.mxu1 %v2853_v33 }
  0x24   :  { %505 = vmatpush1.msra.mxu0 %v2781_v17  ;;  %620 = vmatprep.subr.mxu1 %v2723_v4 }
  0x25   :  { %506 = vmatprep.subr.mxu0 %v2790_v19 }
  0x26   :  { %2412 = vmatmul.mubr.msk.f32.gmra.mxu0 %vm78_vm0, %v31_v38 }
  0x27   :  { %203 = vmatprep.mubr.f32.mxu0 %v2665_v3  ;;  %507 = vmatpush1.msra.mxu0 %v2799_v21 }
  0x28   :  { %508 = vmatprep.subr.mxu0 %v2808_v23 }
  0x29   :  { %509 = vmatpush1.msra.mxu0 %v2817_v25 }
  0x2a   :  { %2413 = vmatmul.mubr.msk.f32.gmra.mxu0 %vm78_vm0, %v32_v39  ;;  %510 = vmatprep.subr.mxu0 %v2826_v27 }
  0x2b   :  { %209 = vmatprep.mubr.f32.mxu0 %v2665_v3  ;;  %511 = vmatpush1.msra.mxu0 %v2835_v29 }
  0x2c   :  { %512 = vmatprep.subr.mxu0 %v2844_v31 }
  0x2d   :  { %513 = vmatpush1.msra.mxu0 %v2853_v33 }
  0x2e   :  { %2414 = vmatmul.mubr.msk.f32.gmra.mxu0 %vm78_vm0, %v33_v40  ;;  %742 = vmatprep.subr.mxu0 %v2723_v4 }
  0x2f   :  { %546 = vmatprep.mubr.f32.mxu0 %v2665_v3 }
  0xd2   :  { %v169_v48 = vpop.f32.mrf.mxu0 }
  0xd3   :  { %v170_v49 = vadd.f32 %v169_v48, %v71_v46  ;;  %v303_v50 = vpop.f32.mrf.mxu1 }
  0xd4   :  { %v171_v51 = vpop.f32.mrf.mxu0 }
  0xd5   :  { %v2942_v52 = vadd.f32 %v171_v51, %v75_v47  ;;  %v308_v53 = vadd.f32 %v303_v50, %v170_v49  ;;  %v305_v38 = vpop.f32.mrf.mxu1 }
  0xd6   :  { %v175_v54 = vpop.f32.mrf.mxu0 }
  0xd7   :  { %v2415_v55 = vmul.f32 -1.442695, %v308_v53  ;;  %v2944_v56 = vadd.f32 %v175_v54, %v71_v46  ;;  %341 = vrot.lane.b32.xlu0 %v308_v53, %s2666_s0 }
  0xd8   :  { %v177_v57 = vpop.f32.mrf.mxu0 }
  0xd9   :  { %2473 = vpow2.f32 %v2415_v55  ;;  %v2947_v58 = vadd.f32 %v177_v57, %v75_v47 }
  0xda   :  { %v181_v59 = vpop.f32.mrf.mxu0 }
  0xdb   :  { %v2949_v60 = vadd.f32 %v181_v59, %v71_v46 }
  0xdc   :  { %v183_v61 = vpop.f32.mrf.mxu0 }
  0xdd   :  { %v2951_v62 = vadd.f32 %v183_v61, %v75_v47 }
  0xde   :  { %v187_v63 = vpop.f32.mrf.mxu0 }
  0xdf   :  { %v2953_v0 = vadd.f32 %v187_v63, %v71_v46 }
  0xe0   :  { %v189_v1 = vpop.f32.mrf.mxu0 }
  0xe1   :  { %v2955_v2 = vadd.f32 %v189_v1, %v75_v47 }
  0xe2   :  { %v193_v5 = vpop.f32.mrf.mxu0 }
  0xe3   :  { %v2957_v7 = vadd.f32 %v193_v5, %v71_v46 }
  0xe4   :  { %v195_v9 = vpop.f32.mrf.mxu0 }
  0xe5   :  { %v2959_v12 = vadd.f32 %v195_v9, %v75_v47 }
  0xe6   :  { %v2474_v14 = vpop.eup %2473  ;;  %v199_v16 = vpop.f32.mrf.mxu0 }
  0xe7   :  { %v316_v18 = vadd.f32 1.0, %v2474_v14  ;;  %v2961_v20 = vadd.f32 %v199_v16, %v71_v46 }
  0xe8   :  { %v201_v22 = vpop.f32.mrf.mxu0 }
  0xe9   :  { %v2963_v24 = vadd.f32 %v201_v22, %v75_v47  ;;  %2475 = vrcp.f32 %v316_v18 }
  0xea   :  { %v205_v26 = vpop.f32.mrf.mxu0 }
  0xeb   :  { %v2965_v28 = vadd.f32 %v205_v26, %v71_v46 }
  0xec   :  { %v207_v30 = vpop.f32.mrf.mxu0 }
  0xed   :  { %v208_v32 = vadd.f32 %v207_v30, %v75_v47 }
  0xee   :  { %v211_v34 = vpop.f32.mrf.mxu0 }
  0xef   :  { %v2967_v35 = vadd.f32 %v211_v34, %v71_v46 }
  0xf0   :  { %v213_v36 = vpop.f32.mrf.mxu0 }
  0xf1   :  { %v214_v37 = vadd.f32 %v213_v36, %v75_v47 }
  0xf3   :  { %v309_v39 = vadd.f32 %v305_v38, %v214_v37 }
  0xf5   :  { %v2416_v40 = vmul.f32 -1.442695, %v309_v39  ;;  %345 = vrot.lane.b32.xlu0 %v309_v39, %s2667_s2 }
  0xf6   :  { %v2476_v41 = vpop.eup %2475 }
  0xf7   :  { %2477 = vpow2.f32 %v2416_v40 }
  0xf9   :  { %333 = vrot.lane.b32.xlu0 %v2476_v41, %s2668_s12 }
 0x104   :  { %v2478_v44 = vpop.eup %2477 }
 0x105   :  { %v317_v48 = vadd.f32 1.0, %v2478_v44 }
 0x107   :  { %2479 = vrcp.f32 %v317_v48 }
 0x114   :  { %v2480_v49 = vpop.eup %2479 }
 0x115   :  { %323 = vrot.lane.b32.xlu1 %v2480_v49, %s2668_s12 }
 0x119   :  { %329 = vrot.lane.b32.xlu1 %v2476_v41, %s2667_s2 }
 0x11d   :  { %336 = vrot.lane.b32.xlu1 %v2480_v49, %s2666_s0 }
 0x149   :  { %v342_v46 = vpop.permute.xlu0 %341 }
 0x167   :  { %v346_v47 = vpop.permute.xlu0 %345 }
 0x168   :  { %v348_v50 = vsel %vm326_vm1, %v342_v46, %v346_v47 }
 0x169   :  { %2481 = vtanh.f32 %v348_v50 }
 0x16b   :  { %v334_v5 = vpop.permute.xlu0 %333 }
 0x176   :  { %v2482_v55 = vpop.eup %2481 }
 0x187   :  { %v324_v51 = vpop.permute.xlu1 %323 }
 0x188   :  { %v327_v53 = vsel %vm326_vm1, %v2476_v41, %v324_v51 }
 0x189   :  { %v351_v59 = vmul.f32 %v2482_v55, %v327_v53 }
 0x18b   :  { %v330_v54 = vpop.permute.xlu1 %329 }
 0x18c   :  { %v332_v57 = vsel %vm326_vm1, %v330_v54, %v2480_v49 }
 0x18d   :  { %v350_v61 = vmul.f32 0.0, %v332_v57 }
 0x18f   :  { %v352_v63 = vadd.f32 %v351_v59, %v350_v61  ;;  %v337_v1 = vpop.permute.xlu1 %336 }
 0x190   :  { %v339_v14 = vsel %vm326_vm1, %v334_v5, %v337_v1 }
 0x191   :  { %2483 = vtanh.f32 %v352_v63 }
 0x19e   :  { %v2484_v9 = vpop.eup %2483 }
 0x19f   :  { %v2978_v16 = vmul.f32 %v2484_v9, %v339_v14 }
 0x1a1   :  { %2417 = vmatmul.mubr.msk.f32.vlgmr.msra.gmra.mxu1 %vm78_vm0, %v2978_v16 }
 0x1a2   :  { %621 = vmatpush1.msra.mxu1 %v2731_v6  ;;  %668 = vmatprep.mubr.f32.mxu1 %v2665_v3 }
 0x1a3   :  { %622 = vmatprep.subr.mxu1 %v2740_v8 }
 0x1a4   :  { %623 = vmatpush1.msra.mxu1 %v2749_v10 }
 0x1a5   :  { %624 = vmatprep.subr.mxu1 %v2754_v11 }
 0x1a6   :  { %625 = vmatpush1.msra.mxu1 %v2763_v13 }
 0x1a7   :  { %626 = vmatprep.subr.mxu1 %v2772_v15 }
 0x1a8   :  { %627 = vmatpush1.msra.mxu1 %v2781_v17 }
 0x1a9   :  { %628 = vmatprep.subr.mxu1 %v2790_v19 }
 0x1aa   :  { %629 = vmatpush1.msra.mxu1 %v2799_v21 }
 0x1ab   :  { %630 = vmatprep.subr.mxu1 %v2808_v23 }
 0x1ac   :  { %631 = vmatpush1.msra.mxu1 %v2817_v25 }
 0x1ad   :  { %632 = vmatprep.subr.mxu1 %v2826_v27 }
 0x1ae   :  { %633 = vmatpush1.msra.mxu1 %v2835_v29 }
 0x1af   :  { %634 = vmatprep.subr.mxu1 %v2844_v31 }
 0x1b0   :  { %635 = vmatpush1.msra.mxu1 %v2853_v33 }
 0x1b1   :  { %864 = vmatprep.subr.mxu1 %v2723_v4 }
 0x261   :  { %v426_v18 = vpop.f32.mrf.mxu1 }
 0x262   :  { %v431_v22 = vadd.f32 %v426_v18, %v2944_v56 }
 0x263   :  { %v428_v26 = vpop.f32.mrf.mxu1 }
 0x264   :  { %v2418_v30 = vmul.f32 -1.442695, %v431_v22  ;;  %v432_v34 = vadd.f32 %v428_v26, %v208_v32  ;;  %463 = vrot.lane.b32.xlu0 %v431_v22, %s2666_s0 }
 0x266   :  { %2485 = vpow2.f32 %v2418_v30  ;;  %v2419_v36 = vmul.f32 -1.442695, %v432_v34  ;;  %467 = vrot.lane.b32.xlu1 %v432_v34, %s2667_s2 }
 0x268   :  { %2487 = vpow2.f32 %v2419_v36 }
 0x273   :  { %v2486_v37 = vpop.eup %2485 }
 0x274   :  { %v439_v38 = vadd.f32 1.0, %v2486_v37 }
 0x275   :  { %v2488_v39 = vpop.eup %2487 }
 0x276   :  { %2489 = vrcp.f32 %v439_v38  ;;  %v440_v40 = vadd.f32 1.0, %v2488_v39 }
 0x278   :  { %2491 = vrcp.f32 %v440_v40 }
 0x283   :  { %v2490_v41 = vpop.eup %2489 }
 0x284   :  { %451 = vrot.lane.b32.xlu1 %v2490_v41, %s2667_s2 }
 0x285   :  { %v2492_v56 = vpop.eup %2491 }
 0x286   :  { %446 = vrot.lane.b32.xlu0 %v2492_v56, %s2668_s12 }
 0x288   :  { %458 = vrot.lane.b32.xlu1 %v2492_v56, %s2666_s0 }
 0x28a   :  { %455 = vrot.lane.b32.xlu0 %v2490_v41, %s2668_s12 }
 0x2d6   :  { %v464_v44 = vpop.permute.xlu0 %463 }
 0x2d8   :  { %v468_v32 = vpop.permute.xlu1 %467 }
 0x2d9   :  { %v470_v48 = vsel %vm326_vm1, %v464_v44, %v468_v32 }
 0x2da   :  { %2493 = vtanh.f32 %v470_v48 }
 0x2e7   :  { %v2494_v50 = vpop.eup %2493 }
 0x2f6   :  { %v452_v49 = vpop.permute.xlu1 %451 }
 0x2f7   :  { %v454_v46 = vsel %vm326_vm1, %v452_v49, %v2492_v56 }
 0x2f8   :  { %v447_v47 = vpop.permute.xlu0 %446  ;;  %v472_v53 = vmul.f32 %v454_v46, %v352_v63 }
 0x2f9   :  { %v449_v51 = vsel %vm326_vm1, %v2490_v41, %v447_v47 }
 0x2fa   :  { %v473_v54 = vmul.f32 %v2494_v50, %v449_v51  ;;  %v459_v59 = vpop.permute.xlu1 %458 }
 0x2fc   :  { %v474_v55 = vadd.f32 %v473_v54, %v472_v53  ;;  %v456_v57 = vpop.permute.xlu0 %455 }
 0x2fd   :  { %v461_v1 = vsel %vm326_vm1, %v456_v57, %v459_v59 }
 0x2fe   :  { %2495 = vtanh.f32 %v474_v55 }
 0x30b   :  { %v2496_v61 = vpop.eup %2495 }
 0x30c   :  { %v3010_v5 = vmul.f32 %v2496_v61, %v461_v1 }
 0x30e   :  { %2420 = vmatmul.mubr.msk.f32.vlgmr.msra.gmra.mxu0 %vm78_vm0, %v3010_v5 }
 0x30f   :  { %743 = vmatpush1.msra.mxu0 %v2731_v6  ;;  %790 = vmatprep.mubr.f32.mxu0 %v2665_v3 }
 0x310   :  { %744 = vmatprep.subr.mxu0 %v2740_v8 }
 0x311   :  { %745 = vmatpush1.msra.mxu0 %v2749_v10 }
 0x312   :  { %746 = vmatprep.subr.mxu0 %v2754_v11 }
 0x313   :  { %747 = vmatpush1.msra.mxu0 %v2763_v13 }
 0x314   :  { %748 = vmatprep.subr.mxu0 %v2772_v15 }
 0x315   :  { %749 = vmatpush1.msra.mxu0 %v2781_v17 }
 0x316   :  { %750 = vmatprep.subr.mxu0 %v2790_v19 }
 0x317   :  { %751 = vmatpush1.msra.mxu0 %v2799_v21 }
 0x318   :  { %752 = vmatprep.subr.mxu0 %v2808_v23 }
 0x319   :  { %753 = vmatpush1.msra.mxu0 %v2817_v25 }
 0x31a   :  { %754 = vmatprep.subr.mxu0 %v2826_v27 }
 0x31b   :  { %755 = vmatpush1.msra.mxu0 %v2835_v29 }
 0x31c   :  { %756 = vmatprep.subr.mxu0 %v2844_v31 }
 0x31d   :  { %757 = vmatpush1.msra.mxu0 %v2853_v33 }
 0x31e   :  { %986 = vmatprep.subr.mxu0 %v2723_v4 }
 0x3ce   :  { %v548_v63 = vpop.f32.mrf.mxu0 }
 0x3cf   :  { %v553_v9 = vadd.f32 %v548_v63, %v2949_v60 }
 0x3d0   :  { %v550_v14 = vpop.f32.mrf.mxu0 }
 0x3d1   :  { %v2421_v18 = vmul.f32 -1.442695, %v553_v9  ;;  %v554_v22 = vadd.f32 %v550_v14, %v2963_v24  ;;  %585 = vrot.lane.b32.xlu0 %v553_v9, %s2666_s0 }
 0x3d3   :  { %2497 = vpow2.f32 %v2421_v18  ;;  %v2422_v26 = vmul.f32 -1.442695, %v554_v22  ;;  %589 = vrot.lane.b32.xlu1 %v554_v22, %s2667_s2 }
 0x3d5   :  { %2499 = vpow2.f32 %v2422_v26 }
 0x3e0   :  { %v2498_v30 = vpop.eup %2497 }
 0x3e1   :  { %v561_v34 = vadd.f32 1.0, %v2498_v30 }
 0x3e2   :  { %v2500_v36 = vpop.eup %2499 }
 0x3e3   :  { %2501 = vrcp.f32 %v561_v34  ;;  %v562_v37 = vadd.f32 1.0, %v2500_v36 }
 0x3e5   :  { %2503 = vrcp.f32 %v562_v37 }
 0x3f0   :  { %v2502_v38 = vpop.eup %2501 }
 0x3f1   :  { %573 = vrot.lane.b32.xlu1 %v2502_v38, %s2667_s2 }
 0x3f2   :  { %v2504_v60 = vpop.eup %2503 }
 0x3f3   :  { %568 = vrot.lane.b32.xlu0 %v2504_v60, %s2668_s12 }
 0x3f5   :  { %580 = vrot.lane.b32.xlu1 %v2504_v60, %s2666_s0 }
 0x3f7   :  { %577 = vrot.lane.b32.xlu0 %v2502_v38, %s2668_s12 }
 0x443   :  { %v586_v39 = vpop.permute.xlu0 %585 }
 0x445   :  { %v590_v24 = vpop.permute.xlu1 %589 }
 0x446   :  { %v592_v40 = vsel %vm326_vm1, %v586_v39, %v590_v24 }
 0x447   :  { %2505 = vtanh.f32 %v592_v40 }
 0x454   :  { %v2506_v44 = vpop.eup %2505 }
 0x463   :  { %v574_v41 = vpop.permute.xlu1 %573 }
 0x464   :  { %v576_v56 = vsel %vm326_vm1, %v574_v41, %v2504_v60 }
 0x465   :  { %v569_v32 = vpop.permute.xlu0 %568  ;;  %v594_v49 = vmul.f32 %v576_v56, %v474_v55 }
 0x466   :  { %v571_v48 = vsel %vm326_vm1, %v2502_v38, %v569_v32 }
 0x467   :  { %v595_v46 = vmul.f32 %v2506_v44, %v571_v48  ;;  %v581_v51 = vpop.permute.xlu1 %580 }
 0x469   :  { %v596_v47 = vadd.f32 %v595_v46, %v594_v49  ;;  %v578_v50 = vpop.permute.xlu0 %577 }
 0x46a   :  { %v583_v54 = vsel %vm326_vm1, %v578_v50, %v581_v51 }
 0x46b   :  { %2507 = vtanh.f32 %v596_v47 }
 0x478   :  { %v2508_v53 = vpop.eup %2507 }
 0x479   :  { %v3043_v57 = vmul.f32 %v2508_v53, %v583_v54 }
 0x47b   :  { %2423 = vmatmul.mubr.msk.f32.vlgmr.msra.gmra.mxu1 %vm78_vm0, %v3043_v57 }
 0x47c   :  { %865 = vmatpush1.msra.mxu1 %v2731_v6  ;;  %912 = vmatprep.mubr.f32.mxu1 %v2665_v3 }
 0x47d   :  { %866 = vmatprep.subr.mxu1 %v2740_v8 }
 0x47e   :  { %867 = vmatpush1.msra.mxu1 %v2749_v10 }
 0x47f   :  { %868 = vmatprep.subr.mxu1 %v2754_v11 }
 0x480   :  { %869 = vmatpush1.msra.mxu1 %v2763_v13 }
 0x481   :  { %870 = vmatprep.subr.mxu1 %v2772_v15 }
 0x482   :  { %871 = vmatpush1.msra.mxu1 %v2781_v17 }
 0x483   :  { %872 = vmatprep.subr.mxu1 %v2790_v19 }
 0x484   :  { %873 = vmatpush1.msra.mxu1 %v2799_v21 }
 0x485   :  { %874 = vmatprep.subr.mxu1 %v2808_v23 }
 0x486   :  { %875 = vmatpush1.msra.mxu1 %v2817_v25 }
 0x487   :  { %876 = vmatprep.subr.mxu1 %v2826_v27 }
 0x488   :  { %877 = vmatpush1.msra.mxu1 %v2835_v29 }
 0x489   :  { %878 = vmatprep.subr.mxu1 %v2844_v31 }
 0x48a   :  { %879 = vmatpush1.msra.mxu1 %v2853_v33 }
 0x48b   :  { %1108 = vmatprep.subr.mxu1 %v2723_v4 }
 0x53b   :  { %v670_v55 = vpop.f32.mrf.mxu1 }
 0x53c   :  { %v675_v59 = vadd.f32 %v670_v55, %v2953_v0 }
 0x53d   :  { %v672_v61 = vpop.f32.mrf.mxu1 }
 0x53e   :  { %v2424_v1 = vmul.f32 -1.442695, %v675_v59  ;;  %v676_v63 = vadd.f32 %v672_v61, %v2959_v12  ;;  %707 = vrot.lane.b32.xlu0 %v675_v59, %s2666_s0 }
 0x540   :  { %2509 = vpow2.f32 %v2424_v1  ;;  %v2425_v9 = vmul.f32 -1.442695, %v676_v63  ;;  %711 = vrot.lane.b32.xlu1 %v676_v63, %s2667_s2 }
 0x542   :  { %2511 = vpow2.f32 %v2425_v9 }
 0x54d   :  { %v2510_v14 = vpop.eup %2509 }
 0x54e   :  { %v683_v18 = vadd.f32 1.0, %v2510_v14 }
 0x54f   :  { %v2512_v22 = vpop.eup %2511 }
 0x550   :  { %2513 = vrcp.f32 %v683_v18  ;;  %v684_v26 = vadd.f32 1.0, %v2512_v22 }
 0x552   :  { %2515 = vrcp.f32 %v684_v26 }
 0x55d   :  { %v2514_v4 = vpop.eup %2513 }
 0x55e   :  { %695 = vrot.lane.b32.xlu1 %v2514_v4, %s2667_s2 }
 0x55f   :  { %v2516_v0 = vpop.eup %2515 }
 0x560   :  { %690 = vrot.lane.b32.xlu0 %v2516_v0, %s2668_s12 }
 0x562   :  { %702 = vrot.lane.b32.xlu1 %v2516_v0, %s2666_s0 }
 0x564   :  { %699 = vrot.lane.b32.xlu0 %v2514_v4, %s2668_s12 }
 0x5b0   :  { %v708_v30 = vpop.permute.xlu0 %707 }
 0x5b2   :  { %v712_v12 = vpop.permute.xlu1 %711 }
 0x5b3   :  { %v714_v34 = vsel %vm326_vm1, %v708_v30, %v712_v12 }
 0x5b4   :  { %2517 = vtanh.f32 %v714_v34 }
 0x5c1   :  { %v2518_v60 = vpop.eup %2517 }
 0x5d0   :  { %v696_v36 = vpop.permute.xlu1 %695 }
 0x5d1   :  { %v698_v37 = vsel %vm326_vm1, %v696_v36, %v2516_v0 }
 0x5d2   :  { %v691_v38 = vpop.permute.xlu0 %690  ;;  %v716_v39 = vmul.f32 %v698_v37, %v596_v47 }
 0x5d3   :  { %v693_v24 = vsel %vm326_vm1, %v2514_v4, %v691_v38 }
 0x5d4   :  { %v717_v40 = vmul.f32 %v2518_v60, %v693_v24  ;;  %v703_v32 = vpop.permute.xlu1 %702 }
 0x5d6   :  { %v718_v41 = vadd.f32 %v717_v40, %v716_v39  ;;  %v700_v56 = vpop.permute.xlu0 %699 }
 0x5d7   :  { %v705_v48 = vsel %vm326_vm1, %v700_v56, %v703_v32 }
 0x5d8   :  { %2519 = vtanh.f32 %v718_v41 }
 0x5e5   :  { %v2520_v44 = vpop.eup %2519 }
 0x5e6   :  { %v3076_v49 = vmul.f32 %v2520_v44, %v705_v48 }
 0x5e8   :  { %2426 = vmatmul.mubr.msk.f32.vlgmr.msra.gmra.mxu0 %vm78_vm0, %v3076_v49 }
 0x5e9   :  { %987 = vmatpush1.msra.mxu0 %v2731_v6  ;;  %1034 = vmatprep.mubr.f32.mxu0 %v2665_v3 }
 0x5ea   :  { %988 = vmatprep.subr.mxu0 %v2740_v8 }
 0x5eb   :  { %989 = vmatpush1.msra.mxu0 %v2749_v10 }
 0x5ec   :  { %990 = vmatprep.subr.mxu0 %v2754_v11 }
 0x5ed   :  { %991 = vmatpush1.msra.mxu0 %v2763_v13 }
 0x5ee   :  { %992 = vmatprep.subr.mxu0 %v2772_v15 }
 0x5ef   :  { %993 = vmatpush1.msra.mxu0 %v2781_v17 }
 0x5f0   :  { %994 = vmatprep.subr.mxu0 %v2790_v19 }
 0x5f1   :  { %995 = vmatpush1.msra.mxu0 %v2799_v21 }
 0x5f2   :  { %996 = vmatprep.subr.mxu0 %v2808_v23 }
 0x5f3   :  { %997 = vmatpush1.msra.mxu0 %v2817_v25 }
 0x5f4   :  { %998 = vmatprep.subr.mxu0 %v2826_v27 }
 0x5f5   :  { %999 = vmatpush1.msra.mxu0 %v2835_v29 }
 0x5f6   :  { %1000 = vmatprep.subr.mxu0 %v2844_v31 }
 0x5f7   :  { %1001 = vmatpush1.msra.mxu0 %v2853_v33 }
 0x6a8   :  { %v792_v46 = vpop.f32.mrf.mxu0 }
 0x6a9   :  { %v797_v47 = vadd.f32 %v792_v46, %v2957_v7 }
 0x6aa   :  { %v794_v50 = vpop.f32.mrf.mxu0 }
 0x6ab   :  { %v2427_v51 = vmul.f32 -1.442695, %v797_v47  ;;  %v798_v53 = vadd.f32 %v794_v50, %v2955_v2  ;;  %829 = vrot.lane.b32.xlu0 %v797_v47, %s2666_s0 }
 0x6ad   :  { %2521 = vpow2.f32 %v2427_v51  ;;  %v2428_v54 = vmul.f32 -1.442695, %v798_v53  ;;  %833 = vrot.lane.b32.xlu1 %v798_v53, %s2667_s2 }
 0x6af   :  { %2523 = vpow2.f32 %v2428_v54 }
 0x6ba   :  { %v2522_v55 = vpop.eup %2521 }
 0x6bb   :  { %v805_v59 = vadd.f32 1.0, %v2522_v55 }
 0x6bc   :  { %v2524_v61 = vpop.eup %2523 }
 0x6bd   :  { %2525 = vrcp.f32 %v805_v59  ;;  %v806_v1 = vadd.f32 1.0, %v2524_v61 }
 0x6bf   :  { %2527 = vrcp.f32 %v806_v1 }
 0x6ca   :  { %v2526_v63 = vpop.eup %2525 }
 0x6cb   :  { %817 = vrot.lane.b32.xlu1 %v2526_v63, %s2667_s2 }
 0x6cc   :  { %v2528_v7 = vpop.eup %2527 }
 0x6cd   :  { %812 = vrot.lane.b32.xlu0 %v2528_v7, %s2668_s12 }
 0x6cf   :  { %824 = vrot.lane.b32.xlu1 %v2528_v7, %s2666_s0 }
 0x6d1   :  { %821 = vrot.lane.b32.xlu0 %v2526_v63, %s2668_s12 }
 0x71d   :  { %v830_v9 = vpop.permute.xlu0 %829 }
 0x71f   :  { %v834_v2 = vpop.permute.xlu1 %833 }
 0x720   :  { %v836_v14 = vsel %vm326_vm1, %v830_v9, %v834_v2 }
 0x721   :  { %2529 = vtanh.f32 %v836_v14 }
 0x72e   :  { %v2530_v4 = vpop.eup %2529 }
 0x73d   :  { %v818_v18 = vpop.permute.xlu1 %817 }
 0x73e   :  { %v820_v22 = vsel %vm326_vm1, %v818_v18, %v2528_v7 }
 0x73f   :  { %v813_v26 = vpop.permute.xlu0 %812  ;;  %v838_v12 = vmul.f32 %v820_v22, %v718_v41 }
 0x740   :  { %v815_v0 = vsel %vm326_vm1, %v2526_v63, %v813_v26 }
 0x741   :  { %v839_v30 = vmul.f32 %v2530_v4, %v815_v0  ;;  %v825_v37 = vpop.permute.xlu1 %824 }
 0x743   :  { %v840_v34 = vadd.f32 %v839_v30, %v838_v12  ;;  %v822_v36 = vpop.permute.xlu0 %821 }
 0x744   :  { %v827_v60 = vsel %vm326_vm1, %v822_v36, %v825_v37 }
 0x745   :  { %2531 = vtanh.f32 %v840_v34 }
 0x752   :  { %v2532_v38 = vpop.eup %2531 }
 0x753   :  { %v3108_v24 = vmul.f32 %v2532_v38, %v827_v60 }
 0x755   :  { %2429 = vmatmul.mubr.msk.f32.vlgmr.msra.gmra.mxu1 %vm78_vm0, %v3108_v24 }
 0x756   :  { %1109 = vmatpush1.msra.mxu1 %v2731_v6  ;;  %1156 = vmatprep.mubr.f32.mxu1 %v2665_v3 }
 0x757   :  { %1110 = vmatprep.subr.mxu1 %v2740_v8 }
 0x758   :  { %1111 = vmatpush1.msra.mxu1 %v2749_v10 }
 0x759   :  { %1112 = vmatprep.subr.mxu1 %v2754_v11 }
 0x75a   :  { %1113 = vmatpush1.msra.mxu1 %v2763_v13 }
 0x75b   :  { %1114 = vmatprep.subr.mxu1 %v2772_v15 }
 0x75c   :  { %1115 = vmatpush1.msra.mxu1 %v2781_v17 }
 0x75d   :  { %1116 = vmatprep.subr.mxu1 %v2790_v19 }
 0x75e   :  { %1117 = vmatpush1.msra.mxu1 %v2799_v21 }
 0x75f   :  { %1118 = vmatprep.subr.mxu1 %v2808_v23 }
 0x760   :  { %1119 = vmatpush1.msra.mxu1 %v2817_v25 }
 0x761   :  { %1120 = vmatprep.subr.mxu1 %v2826_v27 }
 0x762   :  { %1121 = vmatpush1.msra.mxu1 %v2835_v29 }
 0x763   :  { %1122 = vmatprep.subr.mxu1 %v2844_v31 }
 0x764   :  { %1123 = vmatpush1.msra.mxu1 %v2853_v33 }
 0x815   :  { %v914_v6 = vpop.f32.mrf.mxu1 }
 0x816   :  { %v919_v8 = vadd.f32 %v914_v6, %v2961_v20 }
 0x817   :  { %v916_v10 = vpop.f32.mrf.mxu1 }
 0x818   :  { %v2430_v11 = vmul.f32 -1.442695, %v919_v8  ;;  %v920_v13 = vadd.f32 %v916_v10, %v2951_v62  ;;  %951 = vrot.lane.b32.xlu0 %v919_v8, %s2666_s0 }
 0x81a   :  { %2533 = vpow2.f32 %v2430_v11  ;;  %v2431_v15 = vmul.f32 -1.442695, %v920_v13  ;;  %955 = vrot.lane.b32.xlu1 %v920_v13, %s2667_s2 }
 0x81c   :  { %2535 = vpow2.f32 %v2431_v15 }
 0x827   :  { %v2534_v17 = vpop.eup %2533 }
 0x828   :  { %v927_v19 = vadd.f32 1.0, %v2534_v17 }
 0x829   :  { %v2536_v21 = vpop.eup %2535 }
 0x82a   :  { %2537 = vrcp.f32 %v927_v19  ;;  %v928_v23 = vadd.f32 1.0, %v2536_v21 }
 0x82c   :  { %2539 = vrcp.f32 %v928_v23 }
 0x837   :  { %v2538_v25 = vpop.eup %2537 }
 0x838   :  { %939 = vrot.lane.b32.xlu1 %v2538_v25, %s2667_s2 }
 0x839   :  { %v2540_v27 = vpop.eup %2539 }
 0x83a   :  { %934 = vrot.lane.b32.xlu0 %v2540_v27, %s2668_s12 }
 0x83c   :  { %946 = vrot.lane.b32.xlu1 %v2540_v27, %s2666_s0 }
 0x83e   :  { %943 = vrot.lane.b32.xlu0 %v2538_v25, %s2668_s12 }
 0x88a   :  { %v952_v31 = vpop.permute.xlu0 %951 }
 0x88c   :  { %v956_v29 = vpop.permute.xlu1 %955 }
 0x88d   :  { %v958_v33 = vsel %vm326_vm1, %v952_v31, %v956_v29  ;;  %v1230_v31 = vld [vmem:[%s3681_s4 + $0x68] sm:$0xff] }
 0x88e   :  { %2541 = vtanh.f32 %v958_v33  ;;  %v3181_v33 = vld [vmem:[%s3682_s6 + $0x78] sm:$0xff] }
 0x88f   :  { %1432 = vmatprep.subr.mxu1 %v3181_v33 }
 0x89b   :  { %v2542_v40 = vpop.eup %2541 }
 0x8aa   :  { %v940_v62 = vpop.permute.xlu1 %939 }
 0x8ab   :  { %v942_v20 = vsel %vm326_vm1, %v940_v62, %v2540_v27  ;;  %v1229_v62 = vld [vmem:[%s3681_s4 + $0x60] sm:$0xff] }
 0x8ac   :  { %v935_v39 = vpop.permute.xlu0 %934  ;;  %v960_v56 = vmul.f32 %v942_v20, %v840_v34  ;;  %v3190_v20 = vld [vmem:[%s3682_s6 + $0x70] sm:$0xff] }
 0x8ad   :  { %v937_v41 = vsel %vm326_vm1, %v2538_v25, %v935_v39  ;;  %v1228_v39 = vld [vmem:[%s3681_s4 + $0x58] sm:$0xff] }
 0x8ae   :  { %v961_v32 = vmul.f32 %v2542_v40, %v937_v41  ;;  %v947_v46 = vpop.permute.xlu1 %946  ;;  %v3199_v40 = vld [vmem:[%s3682_s6 + $0x68] sm:$0xff] }
 0x8b0   :  { %v962_v44 = vadd.f32 %v961_v32, %v960_v56  ;;  %v944_v48 = vpop.permute.xlu0 %943  ;;  %v1227_v56 = vld [vmem:[%s3681_s4 + $0x50] sm:$0xff]  ;;  %v3210_v32 = vld [vmem:[%s3682_s6 + $0x60] sm:$0xff] }
 0x8b1   :  { %v949_v50 = vsel %vm326_vm1, %v944_v48, %v947_v46  ;;  %v3220_v48 = vld [vmem:[%s3682_s6 + $0x58] sm:$0xff] }
 0x8b2   :  { %2543 = vtanh.f32 %v962_v44 }
 0x8bf   :  { %v2544_v47 = vpop.eup %2543 }
 0x8c0   :  { %v3140_v51 = vmul.f32 %v2544_v47, %v949_v50  ;;  %v1225_v47 = vld [vmem:[%s3681_s4 + $0x40] sm:$0xff]  ;;  %v3231_v50 = vld [vmem:[%s3682_s6 + $0x50] sm:$0xff] }
 0x8c2   :  { %2432 = vmatmul.mubr.msk.f32.vlgmr.msra.gmra.mxu0 %vm78_vm0, %v3140_v51 }
 0x8c3   :  { %1349 = vmatprep.mubr.f32.mxu0 %v2665_v3 }
 0x982   :  { %v1036_v53 = vpop.f32.mrf.mxu0 }
 0x983   :  { %v1041_v54 = vadd.f32 %v1036_v53, %v2965_v28  ;;  %v1224_v53 = vld [vmem:[%s3681_s4 + $0x38] sm:$0xff] }
 0x984   :  { %v1038_v55 = vpop.f32.mrf.mxu0 }
 0x985   :  { %v2433_v59 = vmul.f32 -1.442695, %v1041_v54  ;;  %v1042_v61 = vadd.f32 %v1038_v55, %v2947_v58  ;;  %1073 = vrot.lane.b32.xlu0 %v1041_v54, %s2666_s0  ;;  %v3242_v54 = vld [vmem:[%s3682_s6 + $0x48] sm:$0xff]  ;;  %v1223_v55 = vld [vmem:[%s3681_s4 + $0x30] sm:$0xff] }
 0x987   :  { %2545 = vpow2.f32 %v2433_v59  ;;  %v2434_v1 = vmul.f32 -1.442695, %v1042_v61  ;;  %1077 = vrot.lane.b32.xlu1 %v1042_v61, %s2667_s2  ;;  %v3251_v59 = vld [vmem:[%s3682_s6 + $0x40] sm:$0xff]  ;;  %v1222_v61 = vld [vmem:[%s3681_s4 + $0x28] sm:$0xff] }
 0x989   :  { %2547 = vpow2.f32 %v2434_v1  ;;  %v3261_v1 = vld [vmem:[%s3682_s6 + $0x38] sm:$0xff] }
 0x994   :  { %v2546_v63 = vpop.eup %2545 }
 0x995   :  { %v1049_v7 = vadd.f32 1.0, %v2546_v63  ;;  %v1221_v63 = vld [vmem:[%s3681_s4 + $0x20] sm:$0xff] }
 0x996   :  { %v2548_v2 = vpop.eup %2547 }
 0x997   :  { %2549 = vrcp.f32 %v1049_v7  ;;  %v1050_v9 = vadd.f32 1.0, %v2548_v2  ;;  %v3270_v7 = vld [vmem:[%s3682_s6 + $0x30] sm:$0xff]  ;;  %v1220_v2 = vld [vmem:[%s3681_s4 + $0x18] sm:$0xff] }
 0x999   :  { %2551 = vrcp.f32 %v1050_v9  ;;  %v3281_v9 = vld [vmem:[%s3682_s6 + $0x28] sm:$0xff] }
 0x9a4   :  { %v2550_v14 = vpop.eup %2549 }
 0x9a5   :  { %1061 = vrot.lane.b32.xlu1 %v2550_v14, %s2667_s2 }
 0x9a6   :  { %v2552_v28 = vpop.eup %2551 }
 0x9a7   :  { %1056 = vrot.lane.b32.xlu0 %v2552_v28, %s2668_s12 }
 0x9a9   :  { %1068 = vrot.lane.b32.xlu1 %v2552_v28, %s2666_s0 }
 0x9ab   :  { %1065 = vrot.lane.b32.xlu0 %v2550_v14, %s2668_s12 }
 0x9f7   :  { %v1074_v18 = vpop.permute.xlu0 %1073 }
 0x9f9   :  { %v1078_v58 = vpop.permute.xlu1 %1077 }
 0x9fa   :  { %v1080_v22 = vsel %vm326_vm1, %v1074_v18, %v1078_v58  ;;  %v1218_v58 = vld [vmem:[%s3681_s4 + $0x8] sm:$0xff]  ;;  %v3299_v18 = vld [vmem:[%s3682_s6 + $0x18] sm:$0xff] }
 0x9fb   :  { %2553 = vtanh.f32 %v1080_v22  ;;  %v1217_v22 = vld [vmem:[%s3681_s4] sm:$0xff] }
 0xa08   :  { %v2554_v12 = vpop.eup %2553 }
 0xa17   :  { %v1062_v26 = vpop.permute.xlu1 %1061 }
 0xa18   :  { %v1064_v4 = vsel %vm326_vm1, %v1062_v26, %v2552_v28  ;;  %v3290_v28 = vld [vmem:[%s3682_s6 + $0x20] sm:$0xff]  ;;  %v3308_v26 = vld [vmem:[%s3682_s6 + $0x10] sm:$0xff] }
 0xa19   :  { %v1057_v0 = vpop.permute.xlu0 %1056  ;;  %v1082_v34 = vmul.f32 %v1064_v4, %v962_v44  ;;  %v1226_v44 = vld [vmem:[%s3681_s4 + $0x48] sm:$0xff] }
 0xa1a   :  { %v1059_v30 = vsel %vm326_vm1, %v2550_v14, %v1057_v0  ;;  %v1219_v14 = vld [vmem:[%s3681_s4 + $0x10] sm:$0xff]  ;;  %v3314_v4 = vld [vmem:[%s3682_s6 + $0x8] sm:$0xff]  ;;  %v3320_v0 = vld [vmem:[%s3682_s6] sm:$0xff] }
 0xa1b   :  { %v1083_v36 = vmul.f32 %v2554_v12, %v1059_v30  ;;  %v1069_v60 = vpop.permute.xlu1 %1068 }
 0xa1d   :  { %v3156_v37 = vadd.f32 %v1083_v36, %v1082_v34  ;;  %v1066_v38 = vpop.permute.xlu0 %1065 }
 0xa1e   :  { %v1071_v8 = vsel %vm326_vm1, %v1066_v38, %v1069_v60 }
 0xa1f   :  { %2555 = vtanh.f32 %v3156_v37 }
 0xa2c   :  { %v2556_v6 = vpop.eup %2555 }
 0xa2d   :  { %v3160_v10 = vmul.f32 %v2556_v6, %v1071_v8 }
 0xa2f   :  { %2435 = vmatmul.mubr.msk.f32.vlgmr.msra.gmra.mxu1 %vm78_vm0, %v3160_v10 }
 0xa30   :  { %1480 = vmatprep.mubr.f32.mxu1 %v2665_v3  ;;  %1433 = vmatpush1.msra.mxu1 %v3190_v20 }
 0xa31   :  { %1434 = vmatprep.subr.mxu1 %v3199_v40 }
 0xa32   :  { %1435 = vmatpush1.msra.mxu1 %v3210_v32 }
 0xa33   :  { %1436 = vmatprep.subr.mxu1 %v3220_v48 }
 0xa34   :  { %1437 = vmatpush1.msra.mxu1 %v3231_v50 }
 0xa35   :  { %1438 = vmatprep.subr.mxu1 %v3242_v54 }
 0xa36   :  { %1439 = vmatpush1.msra.mxu1 %v3251_v59 }
 0xa37   :  { %1440 = vmatprep.subr.mxu1 %v3261_v1 }
 0xa38   :  { %1441 = vmatpush1.msra.mxu1 %v3270_v7 }
 0xa39   :  { %1442 = vmatprep.subr.mxu1 %v3281_v9 }
 0xa3a   :  { %1443 = vmatpush1.msra.mxu1 %v3290_v28 }
 0xa3b   :  { %1444 = vmatprep.subr.mxu1 %v3299_v18 }
 0xa3c   :  { %1445 = vmatpush1.msra.mxu1 %v3308_v26 }
 0xa3d   :  { %1446 = vmatprep.subr.mxu1 %v3314_v4 }
 0xa3e   :  { %1447 = vmatpush1.msra.mxu1 %v3320_v0 }
 0xa3f   :  { %1481 = vmatmul.mubr.f32.vlgmr.msra.gmra.mxu1 %v2665_v3  ;;  %1554 = vmatprep.subr.mxu1 %v3181_v33 }
 0xa40   :  { %1555 = vmatpush1.msra.mxu1 %v3190_v20  ;;  %1602 = vmatprep.mubr.f32.mxu1 %v2665_v3 }
 0xa41   :  { %1556 = vmatprep.subr.mxu1 %v3199_v40 }
 0xa42   :  { %1557 = vmatpush1.msra.mxu1 %v3210_v32 }
 0xa43   :  { %1558 = vmatprep.subr.mxu1 %v3220_v48 }
 0xa44   :  { %1559 = vmatpush1.msra.mxu1 %v3231_v50 }
 0xa45   :  { %1560 = vmatprep.subr.mxu1 %v3242_v54 }
 0xa46   :  { %1561 = vmatpush1.msra.mxu1 %v3251_v59 }
 0xa47   :  { %1562 = vmatprep.subr.mxu1 %v3261_v1 }
 0xa48   :  { %1563 = vmatpush1.msra.mxu1 %v3270_v7 }
 0xa49   :  { %1564 = vmatprep.subr.mxu1 %v3281_v9 }
 0xa4a   :  { %1565 = vmatpush1.msra.mxu1 %v3290_v28 }
 0xa4b   :  { %1566 = vmatprep.subr.mxu1 %v3299_v18 }
 0xa4c   :  { %1567 = vmatpush1.msra.mxu1 %v3308_v26 }
 0xa4d   :  { %1568 = vmatprep.subr.mxu1 %v3314_v4 }
 0xa4e   :  { %1569 = vmatpush1.msra.mxu1 %v3320_v0 }
 0xa4f   :  { %1798 = vmatprep.subr.mxu1 %v3181_v33 }
 0xaef   :  { %v1158_v11 = vpop.f32.mrf.mxu1 }
 0xaf0   :  { %v1163_v13 = vadd.f32 %v1158_v11, %v2967_v35  ;;  %v1232_v35 = vld [vmem:[%s3681_s4 + $0x78] sm:$0xff] }
 0xaf1   :  { %v1160_v15 = vpop.f32.mrf.mxu1  ;;  %1301 = vmatprep.subr.mxu0 %v1232_v35  ;;  %v1212_v35 = vsel %vm326_vm1, %v3076_v49, %v3108_v24 }
 0xaf2   :  { %v2436_v17 = vmul.f32 -1.442695, %v1163_v13  ;;  %v1164_v19 = vadd.f32 %v1160_v15, %v2942_v52  ;;  %1195 = vrot.lane.b32.xlu0 %v1163_v13, %s2666_s0  ;;  %v1231_v52 = vld [vmem:[%s3681_s4 + $0x70] sm:$0xff] }
 0xaf3   :  { %1302 = vmatpush1.msra.mxu0 %v1231_v52  ;;  %v1213_v52 = vsel %vm326_vm1, %v3108_v24, %v3076_v49  ;;  %v1215_v49 = vsel %vm326_vm1, %v3160_v10, %v3010_v5 }
 0xaf4   :  { %2557 = vpow2.f32 %v2436_v17  ;;  %v2437_v21 = vmul.f32 -1.442695, %v1164_v19  ;;  %1199 = vrot.lane.b32.xlu1 %v1164_v19, %s2667_s2  ;;  %1303 = vmatprep.subr.mxu0 %v1230_v31  ;;  %v1214_v31 = vsel %vm326_vm1, %v3140_v51, %v3043_v57 }
 0xaf5   :  { %1304 = vmatpush1.msra.mxu0 %v1229_v62 }
 0xaf6   :  { %2559 = vpow2.f32 %v2437_v21  ;;  %1305 = vmatprep.subr.mxu0 %v1228_v39 }
 0xaf7   :  { %1306 = vmatpush1.msra.mxu0 %v1227_v56 }
 0xaf8   :  { %1307 = vmatprep.subr.mxu0 %v1226_v44 }
 0xaf9   :  { %1308 = vmatpush1.msra.mxu0 %v1225_v47 }
 0xafa   :  { %1309 = vmatprep.subr.mxu0 %v1224_v53 }
 0xafb   :  { %1310 = vmatpush1.msra.mxu0 %v1223_v55 }
 0xafc   :  { %1311 = vmatprep.subr.mxu0 %v1222_v61 }
 0xafd   :  { %1312 = vmatpush1.msra.mxu0 %v1221_v63 }
 0xafe   :  { %1313 = vmatprep.subr.mxu0 %v1220_v2 }
 0xaff   :  { %1314 = vmatpush1.msra.mxu0 %v1219_v14  ;;  %v1482_v62 = vpop.f32.mrf.mxu1 }
 0xb00   :  { %1315 = vmatprep.subr.mxu0 %v1218_v58 }
 0xb01   :  { %v2558_v23 = vpop.eup %2557  ;;  %1316 = vmatpush1.msra.mxu0 %v1217_v22 }
 0xb02   :  { %v1171_v25 = vadd.f32 1.0, %v2558_v23  ;;  %1676 = vmatprep.subr.mxu0 %v3181_v33 }
 0xb03   :  { %v2560_v27 = vpop.eup %2559 }
 0xb04   :  { %2561 = vrcp.f32 %v1171_v25  ;;  %v1172_v29 = vadd.f32 1.0, %v2560_v27 }
 0xb06   :  { %2563 = vrcp.f32 %v1172_v29  ;;  %v1211_v29 = vsel %vm326_vm1, %v3043_v57, %v3140_v51  ;;  %v1233_v57 = vld [vmem:[%s3683_s5] sm:$0x3] }
 0xb07   :  { %v1254_v51 = vrot.slane %v1233_v57, %v70_v43 }
 0xb11   :  { %v3201_v41 = vpop.eup %2561 }
 0xb12   :  { %1183 = vrot.lane.b32.xlu1 %v3201_v41, %s2667_s2 }
 0xb13   :  { %v3222_v46 = vpop.eup %2563 }
 0xb14   :  { %1178 = vrot.lane.b32.xlu0 %v3222_v46, %s2668_s12 }
 0xb16   :  { %1190 = vrot.lane.b32.xlu1 %v3222_v46, %s2666_s0 }
 0xb18   :  { %1187 = vrot.lane.b32.xlu0 %v3201_v41, %s2668_s12 }
 0xb64   :  { %v1196_v30 = vpop.permute.xlu0 %1195 }
 0xb66   :  { %v1200_v12 = vpop.permute.xlu1 %1199 }
 0xb67   :  { %v1202_v34 = vsel %vm326_vm1, %v1196_v30, %v1200_v12 }
 0xb68   :  { %2565 = vtanh.f32 %v1202_v34 }
 0xb75   :  { %v2566_v6 = vpop.eup %2565 }
 0xb84   :  { %v1184_v36 = vpop.permute.xlu1 %1183 }
 0xb85   :  { %v1186_v38 = vsel %vm326_vm1, %v1184_v36, %v3222_v46 }
 0xb86   :  { %v1179_v60 = vpop.permute.xlu0 %1178  ;;  %v1204_v11 = vmul.f32 %v1186_v38, %v3156_v37  ;;  %v1210_v37 = vsel %vm326_vm1, %v3010_v5, %v3160_v10  ;;  %v1258_v5 = vrot.slane %v1233_v57, %v74_v45 }
 0xb87   :  { %v1181_v8 = vsel %vm326_vm1, %v3201_v41, %v1179_v60 }
 0xb88   :  { %v1205_v13 = vmul.f32 %v2566_v6, %v1181_v8  ;;  %v1191_v19 = vpop.permute.xlu1 %1190 }
 0xb8a   :  { %v1206_v15 = vadd.f32 %v1205_v13, %v1204_v11  ;;  %v1188_v17 = vpop.permute.xlu0 %1187 }
 0xb8b   :  { %v1193_v23 = vsel %vm326_vm1, %v1188_v17, %v1191_v19 }
 0xb8c   :  { %2567 = vtanh.f32 %v1206_v15 }
 0xb99   :  { %v2568_v21 = vpop.eup %2567 }
 0xb9a   :  { %v1208_v25 = vmul.f32 %v2568_v21, %v1193_v23 }
 0xb9c   :  { %v1209_v27 = vsel %vm326_vm1, %v2978_v16, %v1208_v25  ;;  %v1216_v24 = vsel %vm326_vm1, %v1208_v25, %v2978_v16 }
 0xb9d   :  { %2438 = vmatmul.mubr.msk.f32.vlgmr.msra.gmra.mxu0 %vm78_vm0, %v1209_v27 }
 0xb9e   :  { %1355 = vmatprep.mubr.f32.mxu0 %v2665_v3  ;;  %1677 = vmatpush1.msra.mxu0 %v3190_v20 }
 0xb9f   :  { %1678 = vmatprep.subr.mxu0 %v3199_v40 }
 0xba0   :  { %1679 = vmatpush1.msra.mxu0 %v3210_v32 }
 0xba1   :  { %2439 = vmatmul.mubr.msk.f32.gmra.mxu0 %vm78_vm0, %v1210_v37  ;;  %1680 = vmatprep.subr.mxu0 %v3220_v48  ;;  %v1484_v37 = vpop.f32.mrf.mxu1 }
 0xba2   :  { %1361 = vmatprep.mubr.f32.mxu0 %v2665_v3  ;;  %1681 = vmatpush1.msra.mxu0 %v3231_v50 }
 0xba3   :  { %1682 = vmatprep.subr.mxu0 %v3242_v54 }
 0xba4   :  { %1683 = vmatpush1.msra.mxu0 %v3251_v59 }
 0xba5   :  { %2440 = vmatmul.mubr.msk.f32.gmra.mxu0 %vm78_vm0, %v1211_v29  ;;  %1684 = vmatprep.subr.mxu0 %v3261_v1 }
 0xba6   :  { %1367 = vmatprep.mubr.f32.mxu0 %v2665_v3  ;;  %1685 = vmatpush1.msra.mxu0 %v3270_v7 }
 0xba7   :  { %1686 = vmatprep.subr.mxu0 %v3281_v9 }
 0xba8   :  { %1687 = vmatpush1.msra.mxu0 %v3290_v28 }
 0xba9   :  { %2441 = vmatmul.mubr.msk.f32.gmra.mxu0 %vm78_vm0, %v1212_v35  ;;  %1688 = vmatprep.subr.mxu0 %v3299_v18 }
 0xbaa   :  { %1373 = vmatprep.mubr.f32.mxu0 %v2665_v3  ;;  %1689 = vmatpush1.msra.mxu0 %v3308_v26 }
 0xbab   :  { %1690 = vmatprep.subr.mxu0 %v3314_v4 }
 0xbac   :  { %1691 = vmatpush1.msra.mxu0 %v3320_v0 }
 0xbad   :  { %2442 = vmatmul.mubr.msk.f32.gmra.mxu0 %vm78_vm0, %v1213_v52  ;;  %1920 = vmatprep.subr.mxu0 %v3181_v33 }
 0xbae   :  { %1379 = vmatprep.mubr.f32.mxu0 %v2665_v3 }
 0xbb1   :  { %2443 = vmatmul.mubr.msk.f32.gmra.mxu0 %vm78_vm0, %v1214_v31 }
 0xbb2   :  { %1385 = vmatprep.mubr.f32.mxu0 %v2665_v3 }
 0xbb5   :  { %2444 = vmatmul.mubr.msk.f32.gmra.mxu0 %vm78_vm0, %v1215_v49 }
 0xbb6   :  { %1391 = vmatprep.mubr.f32.mxu0 %v2665_v3 }
 0xbb9   :  { %2445 = vmatmul.mubr.msk.f32.gmra.mxu0 %vm78_vm0, %v1216_v24 }
 0xbba   :  { %1724 = vmatprep.mubr.f32.mxu0 %v2665_v3 }
 0xc5d   :  { %v1351_v10 = vpop.f32.mrf.mxu0 }
 0xc5e   :  { %v1352_v39 = vadd.f32 %v1351_v10, %v1254_v51 }
 0xc5f   :  { %v1353_v41 = vpop.f32.mrf.mxu0 }
 0xc60   :  { %v3413_v56 = vadd.f32 %v1353_v41, %v1258_v5  ;;  %v1487_v16 = vadd.f32 %v1482_v62, %v1352_v39 }
 0xc61   :  { %v1357_v44 = vpop.f32.mrf.mxu0 }
 0xc62   :  { %v2446_v46 = vmul.f32 -1.442695, %v1487_v16  ;;  %v3415_v47 = vadd.f32 %v1357_v44, %v1254_v51  ;;  %1519 = vrot.lane.b32.xlu0 %v1487_v16, %s2666_s0 }
 0xc63   :  { %v1359_v53 = vpop.f32.mrf.mxu0 }
 0xc64   :  { %2569 = vpow2.f32 %v2446_v46  ;;  %v3418_v55 = vadd.f32 %v1359_v53, %v1258_v5 }
 0xc65   :  { %v1363_v43 = vpop.f32.mrf.mxu0 }
 0xc66   :  { %v3420_v42 = vadd.f32 %v1363_v43, %v1254_v51 }
 0xc67   :  { %v1365_v45 = vpop.f32.mrf.mxu0 }
 0xc68   :  { %v3422_v61 = vadd.f32 %v1365_v45, %v1258_v5 }
 0xc69   :  { %v1369_v63 = vpop.f32.mrf.mxu0 }
 0xc6a   :  { %v3424_v2 = vadd.f32 %v1369_v63, %v1254_v51 }
 0xc6b   :  { %v1371_v14 = vpop.f32.mrf.mxu0 }
 0xc6c   :  { %v3426_v58 = vadd.f32 %v1371_v14, %v1258_v5 }
 0xc6d   :  { %v1375_v22 = vpop.f32.mrf.mxu0 }
 0xc6e   :  { %v3428_v12 = vadd.f32 %v1375_v22, %v1254_v51 }
 0xc6f   :  { %v1377_v30 = vpop.f32.mrf.mxu0 }
 0xc70   :  { %v3430_v34 = vadd.f32 %v1377_v30, %v1258_v5 }
 0xc71   :  { %v2570_v36 = vpop.eup %2569  ;;  %v1381_v38 = vpop.f32.mrf.mxu0 }
 0xc72   :  { %v1495_v60 = vadd.f32 1.0, %v2570_v36  ;;  %v3432_v6 = vadd.f32 %v1381_v38, %v1254_v51 }
 0xc73   :  { %v1383_v8 = vpop.f32.mrf.mxu0 }
 0xc74   :  { %v3434_v11 = vadd.f32 %v1383_v8, %v1258_v5  ;;  %2571 = vrcp.f32 %v1495_v60 }
 0xc75   :  { %v1387_v13 = vpop.f32.mrf.mxu0 }
 0xc76   :  { %v3436_v15 = vadd.f32 %v1387_v13, %v1254_v51 }
 0xc77   :  { %v1389_v17 = vpop.f32.mrf.mxu0 }
 0xc78   :  { %v1390_v19 = vadd.f32 %v1389_v17, %v1258_v5 }
 0xc79   :  { %v1393_v21 = vpop.f32.mrf.mxu0 }
 0xc7a   :  { %v3438_v23 = vadd.f32 %v1393_v21, %v1254_v51 }
 0xc7b   :  { %v1395_v25 = vpop.f32.mrf.mxu0 }
 0xc7c   :  { %v1396_v27 = vadd.f32 %v1395_v25, %v1258_v5 }
 0xc7e   :  { %v1488_v29 = vadd.f32 %v1484_v37, %v1396_v27 }
 0xc80   :  { %v2447_v35 = vmul.f32 -1.442695, %v1488_v29  ;;  %1523 = vrot.lane.b32.xlu1 %v1488_v29, %s2667_s2 }
 0xc81   :  { %v2572_v52 = vpop.eup %2571 }
 0xc82   :  { %2573 = vpow2.f32 %v2447_v35 }
 0xc84   :  { %1507 = vrot.lane.b32.xlu1 %v2572_v52, %s2667_s2 }
 0xc8f   :  { %v2574_v31 = vpop.eup %2573 }
 0xc90   :  { %v1496_v49 = vadd.f32 1.0, %v2574_v31 }
 0xc92   :  { %2575 = vrcp.f32 %v1496_v49 }
 0xc9f   :  { %v2576_v24 = vpop.eup %2575 }
 0xca0   :  { %1502 = vrot.lane.b32.xlu0 %v2576_v24, %s2668_s12  ;;  %1514 = vrot.lane.b32.xlu1 %v2576_v24, %s2666_s0 }
 0xca4   :  { %1511 = vrot.lane.b32.xlu0 %v2572_v52, %s2668_s12 }
 0xcd4   :  { %v1520_v51 = vpop.permute.xlu0 %1519 }
 0xcf2   :  { %v1524_v57 = vpop.permute.xlu1 %1523 }
 0xcf3   :  { %v1526_v5 = vsel %vm326_vm1, %v1520_v51, %v1524_v57 }
 0xcf4   :  { %2577 = vtanh.f32 %v1526_v5 }
 0xcf6   :  { %v1508_v10 = vpop.permute.xlu1 %1507 }
 0xcf7   :  { %v1510_v62 = vsel %vm326_vm1, %v1508_v10, %v2576_v24 }
 0xcf8   :  { %v1528_v44 = vmul.f32 0.0, %v1510_v62 }
 0xd01   :  { %v2578_v41 = vpop.eup %2577 }
 0xd12   :  { %v1503_v39 = vpop.permute.xlu0 %1502  ;;  %v1515_v45 = vpop.permute.xlu1 %1514 }
 0xd13   :  { %v1505_v16 = vsel %vm326_vm1, %v2572_v52, %v1503_v39 }
 0xd14   :  { %v1529_v46 = vmul.f32 %v2578_v41, %v1505_v16 }
 0xd16   :  { %v1530_v53 = vadd.f32 %v1529_v46, %v1528_v44  ;;  %v1512_v43 = vpop.permute.xlu0 %1511 }
 0xd17   :  { %v1517_v14 = vsel %vm326_vm1, %v1512_v43, %v1515_v45 }
 0xd18   :  { %2579 = vtanh.f32 %v1530_v53 }
 0xd25   :  { %v2580_v63 = vpop.eup %2579 }
 0xd26   :  { %v3449_v22 = vmul.f32 %v2580_v63, %v1517_v14 }
 0xd28   :  { %2448 = vmatmul.mubr.msk.f32.vlgmr.msra.gmra.mxu1 %vm78_vm0, %v3449_v22 }
 0xd29   :  { %1799 = vmatpush1.msra.mxu1 %v3190_v20  ;;  %1846 = vmatprep.mubr.f32.mxu1 %v2665_v3 }
 0xd2a   :  { %1800 = vmatprep.subr.mxu1 %v3199_v40 }
 0xd2b   :  { %1801 = vmatpush1.msra.mxu1 %v3210_v32 }
 0xd2c   :  { %1802 = vmatprep.subr.mxu1 %v3220_v48 }
 0xd2d   :  { %1803 = vmatpush1.msra.mxu1 %v3231_v50 }
 0xd2e   :  { %1804 = vmatprep.subr.mxu1 %v3242_v54 }
 0xd2f   :  { %1805 = vmatpush1.msra.mxu1 %v3251_v59 }
 0xd30   :  { %1806 = vmatprep.subr.mxu1 %v3261_v1 }
 0xd31   :  { %1807 = vmatpush1.msra.mxu1 %v3270_v7 }
 0xd32   :  { %1808 = vmatprep.subr.mxu1 %v3281_v9 }
 0xd33   :  { %1809 = vmatpush1.msra.mxu1 %v3290_v28 }
 0xd34   :  { %1810 = vmatprep.subr.mxu1 %v3299_v18 }
 0xd35   :  { %1811 = vmatpush1.msra.mxu1 %v3308_v26 }
 0xd36   :  { %1812 = vmatprep.subr.mxu1 %v3314_v4 }
 0xd37   :  { %1813 = vmatpush1.msra.mxu1 %v3320_v0 }
 0xd38   :  { %2042 = vmatprep.subr.mxu1 %v3181_v33 }
 0xde8   :  { %v1604_v30 = vpop.f32.mrf.mxu1 }
 0xde9   :  { %v1609_v36 = vadd.f32 %v1604_v30, %v3415_v47 }
 0xdea   :  { %v1606_v38 = vpop.f32.mrf.mxu1 }
 0xdeb   :  { %v2449_v60 = vmul.f32 -1.442695, %v1609_v36  ;;  %v1610_v8 = vadd.f32 %v1606_v38, %v1390_v19  ;;  %1641 = vrot.lane.b32.xlu0 %v1609_v36, %s2666_s0 }
 0xded   :  { %2581 = vpow2.f32 %v2449_v60  ;;  %v2450_v13 = vmul.f32 -1.442695, %v1610_v8  ;;  %1645 = vrot.lane.b32.xlu1 %v1610_v8, %s2667_s2 }
 0xdef   :  { %2583 = vpow2.f32 %v2450_v13 }
 0xdfa   :  { %v2582_v17 = vpop.eup %2581 }
 0xdfb   :  { %v1617_v21 = vadd.f32 1.0, %v2582_v17 }
 0xdfc   :  { %v2584_v25 = vpop.eup %2583 }
 0xdfd   :  { %2585 = vrcp.f32 %v1617_v21  ;;  %v1618_v27 = vadd.f32 1.0, %v2584_v25 }
 0xdff   :  { %2587 = vrcp.f32 %v1618_v27 }
 0xe0a   :  { %v2586_v37 = vpop.eup %2585 }
 0xe0b   :  { %1629 = vrot.lane.b32.xlu1 %v2586_v37, %s2667_s2 }
 0xe0c   :  { %v2588_v47 = vpop.eup %2587 }
 0xe0d   :  { %1624 = vrot.lane.b32.xlu0 %v2588_v47, %s2668_s12 }
 0xe0f   :  { %1636 = vrot.lane.b32.xlu1 %v2588_v47, %s2666_s0 }
 0xe11   :  { %1633 = vrot.lane.b32.xlu0 %v2586_v37, %s2668_s12 }
 0xe5d   :  { %v1642_v29 = vpop.permute.xlu0 %1641 }
 0xe5f   :  { %v1646_v19 = vpop.permute.xlu1 %1645 }
 0xe60   :  { %v1648_v35 = vsel %vm326_vm1, %v1642_v29, %v1646_v19 }
 0xe61   :  { %2589 = vtanh.f32 %v1648_v35 }
 0xe6e   :  { %v2590_v24 = vpop.eup %2589 }
 0xe7d   :  { %v1630_v52 = vpop.permute.xlu1 %1629 }
 0xe7e   :  { %v1632_v31 = vsel %vm326_vm1, %v1630_v52, %v2588_v47 }
 0xe7f   :  { %v1625_v49 = vpop.permute.xlu0 %1624  ;;  %v1650_v51 = vmul.f32 %v1632_v31, %v1530_v53 }
 0xe80   :  { %v1627_v57 = vsel %vm326_vm1, %v2586_v37, %v1625_v49 }
 0xe81   :  { %v1651_v5 = vmul.f32 %v2590_v24, %v1627_v57  ;;  %v1637_v39 = vpop.permute.xlu1 %1636 }
 0xe83   :  { %v1652_v10 = vadd.f32 %v1651_v5, %v1650_v51  ;;  %v1634_v62 = vpop.permute.xlu0 %1633 }
 0xe84   :  { %v1639_v16 = vsel %vm326_vm1, %v1634_v62, %v1637_v39 }
 0xe85   :  { %2591 = vtanh.f32 %v1652_v10 }
 0xe92   :  { %v2592_v41 = vpop.eup %2591 }
 0xe93   :  { %v3481_v44 = vmul.f32 %v2592_v41, %v1639_v16 }
 0xe95   :  { %2451 = vmatmul.mubr.msk.f32.vlgmr.msra.gmra.mxu0 %vm78_vm0, %v3481_v44 }
 0xe96   :  { %1921 = vmatpush1.msra.mxu0 %v3190_v20  ;;  %1968 = vmatprep.mubr.f32.mxu0 %v2665_v3 }
 0xe97   :  { %1922 = vmatprep.subr.mxu0 %v3199_v40 }
 0xe98   :  { %1923 = vmatpush1.msra.mxu0 %v3210_v32 }
 0xe99   :  { %1924 = vmatprep.subr.mxu0 %v3220_v48 }
 0xe9a   :  { %1925 = vmatpush1.msra.mxu0 %v3231_v50 }
 0xe9b   :  { %1926 = vmatprep.subr.mxu0 %v3242_v54 }
 0xe9c   :  { %1927 = vmatpush1.msra.mxu0 %v3251_v59 }
 0xe9d   :  { %1928 = vmatprep.subr.mxu0 %v3261_v1 }
 0xe9e   :  { %1929 = vmatpush1.msra.mxu0 %v3270_v7 }
 0xe9f   :  { %1930 = vmatprep.subr.mxu0 %v3281_v9 }
 0xea0   :  { %1931 = vmatpush1.msra.mxu0 %v3290_v28 }
 0xea1   :  { %1932 = vmatprep.subr.mxu0 %v3299_v18 }
 0xea2   :  { %1933 = vmatpush1.msra.mxu0 %v3308_v26 }
 0xea3   :  { %1934 = vmatprep.subr.mxu0 %v3314_v4 }
 0xea4   :  { %1935 = vmatpush1.msra.mxu0 %v3320_v0 }
 0xea5   :  { %2164 = vmatprep.subr.mxu0 %v3181_v33 }
 0xf55   :  { %v1726_v46 = vpop.f32.mrf.mxu0 }
 0xf56   :  { %v1731_v53 = vadd.f32 %v1726_v46, %v3420_v42 }
 0xf57   :  { %v1728_v43 = vpop.f32.mrf.mxu0 }
 0xf58   :  { %v2452_v45 = vmul.f32 -1.442695, %v1731_v53  ;;  %v1732_v63 = vadd.f32 %v1728_v43, %v3434_v11  ;;  %1763 = vrot.lane.b32.xlu0 %v1731_v53, %s2666_s0 }
 0xf5a   :  { %2593 = vpow2.f32 %v2452_v45  ;;  %v2453_v14 = vmul.f32 -1.442695, %v1732_v63  ;;  %1767 = vrot.lane.b32.xlu1 %v1732_v63, %s2667_s2 }
 0xf5c   :  { %2595 = vpow2.f32 %v2453_v14 }
 0xf67   :  { %v2594_v30 = vpop.eup %2593 }
 0xf68   :  { %v1739_v36 = vadd.f32 1.0, %v2594_v30 }
 0xf69   :  { %v2596_v38 = vpop.eup %2595 }
 0xf6a   :  { %2597 = vrcp.f32 %v1739_v36  ;;  %v1740_v60 = vadd.f32 1.0, %v2596_v38 }
 0xf6c   :  { %2599 = vrcp.f32 %v1740_v60 }
 0xf77   :  { %v2598_v8 = vpop.eup %2597 }
 0xf78   :  { %1751 = vrot.lane.b32.xlu1 %v2598_v8, %s2667_s2 }
 0xf79   :  { %v2600_v42 = vpop.eup %2599 }
 0xf7a   :  { %1746 = vrot.lane.b32.xlu0 %v2600_v42, %s2668_s12 }
 0xf7c   :  { %1758 = vrot.lane.b32.xlu1 %v2600_v42, %s2666_s0 }
 0xf7e   :  { %1755 = vrot.lane.b32.xlu0 %v2598_v8, %s2668_s12 }
 0xfca   :  { %v1764_v13 = vpop.permute.xlu0 %1763 }
 0xfcc   :  { %v1768_v11 = vpop.permute.xlu1 %1767 }
 0xfcd   :  { %v1770_v17 = vsel %vm326_vm1, %v1764_v13, %v1768_v11 }
 0xfce   :  { %2601 = vtanh.f32 %v1770_v17 }
 0xfdb   :  { %v2602_v37 = vpop.eup %2601 }
 0xfea   :  { %v1752_v21 = vpop.permute.xlu1 %1751 }
 0xfeb   :  { %v1754_v25 = vsel %vm326_vm1, %v1752_v21, %v2600_v42 }
 0xfec   :  { %v1747_v27 = vpop.permute.xlu0 %1746  ;;  %v1772_v19 = vmul.f32 %v1754_v25, %v1652_v10 }
 0xfed   :  { %v1749_v47 = vsel %vm326_vm1, %v2598_v8, %v1747_v27 }
 0xfee   :  { %v1773_v29 = vmul.f32 %v2602_v37, %v1749_v47  ;;  %v1759_v31 = vpop.permute.xlu1 %1758 }
 0xff0   :  { %v1774_v35 = vadd.f32 %v1773_v29, %v1772_v19  ;;  %v1756_v52 = vpop.permute.xlu0 %1755 }
 0xff1   :  { %v1761_v24 = vsel %vm326_vm1, %v1756_v52, %v1759_v31 }
 0xff2   :  { %2603 = vtanh.f32 %v1774_v35 }
 0xfff   :  { %v2604_v49 = vpop.eup %2603 }
0x1000   :  { %v3514_v57 = vmul.f32 %v2604_v49, %v1761_v24 }
0x1002   :  { %2454 = vmatmul.mubr.msk.f32.vlgmr.msra.gmra.mxu1 %vm78_vm0, %v3514_v57 }
0x1003   :  { %2043 = vmatpush1.msra.mxu1 %v3190_v20  ;;  %2090 = vmatprep.mubr.f32.mxu1 %v2665_v3 }
0x1004   :  { %2044 = vmatprep.subr.mxu1 %v3199_v40 }
0x1005   :  { %2045 = vmatpush1.msra.mxu1 %v3210_v32 }
0x1006   :  { %2046 = vmatprep.subr.mxu1 %v3220_v48 }
0x1007   :  { %2047 = vmatpush1.msra.mxu1 %v3231_v50 }
0x1008   :  { %2048 = vmatprep.subr.mxu1 %v3242_v54 }
0x1009   :  { %2049 = vmatpush1.msra.mxu1 %v3251_v59 }
0x100a   :  { %2050 = vmatprep.subr.mxu1 %v3261_v1 }
0x100b   :  { %2051 = vmatpush1.msra.mxu1 %v3270_v7 }
0x100c   :  { %2052 = vmatprep.subr.mxu1 %v3281_v9 }
0x100d   :  { %2053 = vmatpush1.msra.mxu1 %v3290_v28 }
0x100e   :  { %2054 = vmatprep.subr.mxu1 %v3299_v18 }
0x100f   :  { %2055 = vmatpush1.msra.mxu1 %v3308_v26 }
0x1010   :  { %2056 = vmatprep.subr.mxu1 %v3314_v4 }
0x1011   :  { %2057 = vmatpush1.msra.mxu1 %v3320_v0 }
0x1012   :  { %2286 = vmatprep.subr.mxu1 %v3181_v33 }
0x10c2   :  { %v1848_v51 = vpop.f32.mrf.mxu1 }
0x10c3   :  { %v1853_v5 = vadd.f32 %v1848_v51, %v3424_v2 }
0x10c4   :  { %v1850_v10 = vpop.f32.mrf.mxu1 }
0x10c5   :  { %v2455_v62 = vmul.f32 -1.442695, %v1853_v5  ;;  %v1854_v39 = vadd.f32 %v1850_v10, %v3430_v34  ;;  %1885 = vrot.lane.b32.xlu0 %v1853_v5, %s2666_s0 }
0x10c7   :  { %2605 = vpow2.f32 %v2455_v62  ;;  %v2456_v41 = vmul.f32 -1.442695, %v1854_v39  ;;  %1889 = vrot.lane.b32.xlu1 %v1854_v39, %s2667_s2 }
0x10c9   :  { %2607 = vpow2.f32 %v2456_v41 }
0x10d4   :  { %v2606_v16 = vpop.eup %2605 }
0x10d5   :  { %v1861_v46 = vadd.f32 1.0, %v2606_v16 }
0x10d6   :  { %v2608_v53 = vpop.eup %2607 }
0x10d7   :  { %2609 = vrcp.f32 %v1861_v46  ;;  %v1862_v43 = vadd.f32 1.0, %v2608_v53 }
0x10d9   :  { %2611 = vrcp.f32 %v1862_v43 }
0x10e4   :  { %v2610_v33 = vpop.eup %2609 }
0x10e5   :  { %1873 = vrot.lane.b32.xlu1 %v2610_v33, %s2667_s2 }
0x10e6   :  { %v2612_v2 = vpop.eup %2611 }
0x10e7   :  { %1868 = vrot.lane.b32.xlu0 %v2612_v2, %s2668_s12 }
0x10e9   :  { %1880 = vrot.lane.b32.xlu1 %v2612_v2, %s2666_s0 }
0x10eb   :  { %1877 = vrot.lane.b32.xlu0 %v2610_v33, %s2668_s12 }
0x1137   :  { %v1886_v45 = vpop.permute.xlu0 %1885 }
0x1139   :  { %v1890_v34 = vpop.permute.xlu1 %1889 }
0x113a   :  { %v1892_v63 = vsel %vm326_vm1, %v1886_v45, %v1890_v34 }
0x113b   :  { %2613 = vtanh.f32 %v1892_v63 }
0x1148   :  { %v2614_v38 = vpop.eup %2613 }
0x1157   :  { %v1874_v14 = vpop.permute.xlu1 %1873 }
0x1158   :  { %v1876_v30 = vsel %vm326_vm1, %v1874_v14, %v2612_v2 }
0x1159   :  { %v1869_v36 = vpop.permute.xlu0 %1868  ;;  %v1894_v8 = vmul.f32 %v1876_v30, %v1774_v35 }
0x115a   :  { %v1871_v60 = vsel %vm326_vm1, %v2610_v33, %v1869_v36 }
0x115b   :  { %v1895_v42 = vmul.f32 %v2614_v38, %v1871_v60  ;;  %v1881_v17 = vpop.permute.xlu1 %1880 }
0x115d   :  { %v1896_v11 = vadd.f32 %v1895_v42, %v1894_v8  ;;  %v1878_v13 = vpop.permute.xlu0 %1877 }
0x115e   :  { %v1883_v25 = vsel %vm326_vm1, %v1878_v13, %v1881_v17 }
0x115f   :  { %2615 = vtanh.f32 %v1896_v11 }
0x116c   :  { %v2616_v21 = vpop.eup %2615 }
0x116d   :  { %v1898_v27 = vmul.f32 %v2616_v21, %v1883_v25 }
0x116f   :  { %2457 = vmatmul.mubr.msk.f32.vlgmr.msra.gmra.mxu0 %vm78_vm0, %v1898_v27 }
0x1170   :  { %2165 = vmatpush1.msra.mxu0 %v3190_v20  ;;  %2212 = vmatprep.mubr.f32.mxu0 %v2665_v3 }
0x1171   :  { %2166 = vmatprep.subr.mxu0 %v3199_v40 }
0x1172   :  { %2167 = vmatpush1.msra.mxu0 %v3210_v32 }
0x1173   :  { %2168 = vmatprep.subr.mxu0 %v3220_v48 }
0x1174   :  { %2169 = vmatpush1.msra.mxu0 %v3231_v50 }
0x1175   :  { %2170 = vmatprep.subr.mxu0 %v3242_v54 }
0x1176   :  { %2171 = vmatpush1.msra.mxu0 %v3251_v59 }
0x1177   :  { %2172 = vmatprep.subr.mxu0 %v3261_v1 }
0x1178   :  { %2173 = vmatpush1.msra.mxu0 %v3270_v7 }
0x1179   :  { %2174 = vmatprep.subr.mxu0 %v3281_v9 }
0x117a   :  { %2175 = vmatpush1.msra.mxu0 %v3290_v28 }
0x117b   :  { %2176 = vmatprep.subr.mxu0 %v3299_v18 }
0x117c   :  { %2177 = vmatpush1.msra.mxu0 %v3308_v26 }
0x117d   :  { %2178 = vmatprep.subr.mxu0 %v3314_v4 }
0x117e   :  { %2179 = vmatpush1.msra.mxu0 %v3320_v0 }
0x122f   :  { %v1970_v37 = vpop.f32.mrf.mxu0 }
0x1230   :  { %v1975_v47 = vadd.f32 %v1970_v37, %v3428_v12 }
0x1231   :  { %v1972_v19 = vpop.f32.mrf.mxu0 }
0x1232   :  { %v2458_v29 = vmul.f32 -1.442695, %v1975_v47  ;;  %v1976_v35 = vadd.f32 %v1972_v19, %v3426_v58  ;;  %2007 = vrot.lane.b32.xlu0 %v1975_v47, %s2666_s0 }
0x1234   :  { %2617 = vpow2.f32 %v2458_v29  ;;  %v2459_v52 = vmul.f32 -1.442695, %v1976_v35  ;;  %2011 = vrot.lane.b32.xlu1 %v1976_v35, %s2667_s2 }
0x1236   :  { %2619 = vpow2.f32 %v2459_v52 }
0x1241   :  { %v2618_v31 = vpop.eup %2617 }
0x1242   :  { %v1983_v49 = vadd.f32 1.0, %v2618_v31 }
0x1243   :  { %v2620_v24 = vpop.eup %2619 }
0x1244   :  { %2621 = vrcp.f32 %v1983_v49  ;;  %v1984_v51 = vadd.f32 1.0, %v2620_v24 }
0x1246   :  { %2623 = vrcp.f32 %v1984_v51 }
0x1251   :  { %v2622_v5 = vpop.eup %2621 }
0x1252   :  { %1995 = vrot.lane.b32.xlu1 %v2622_v5, %s2667_s2 }
0x1253   :  { %v2624_v12 = vpop.eup %2623 }
0x1254   :  { %1990 = vrot.lane.b32.xlu0 %v2624_v12, %s2668_s12 }
0x1256   :  { %2002 = vrot.lane.b32.xlu1 %v2624_v12, %s2666_s0 }
0x1258   :  { %1999 = vrot.lane.b32.xlu0 %v2622_v5, %s2668_s12 }
0x12a4   :  { %v2008_v10 = vpop.permute.xlu0 %2007 }
0x12a6   :  { %v2012_v58 = vpop.permute.xlu1 %2011 }
0x12a7   :  { %v2014_v62 = vsel %vm326_vm1, %v2008_v10, %v2012_v58 }
0x12a8   :  { %2625 = vtanh.f32 %v2014_v62 }
0x12b5   :  { %v2626_v46 = vpop.eup %2625 }
0x12c4   :  { %v1996_v39 = vpop.permute.xlu1 %1995 }
0x12c5   :  { %v1998_v41 = vsel %vm326_vm1, %v1996_v39, %v2624_v12 }
0x12c6   :  { %v1991_v16 = vpop.permute.xlu0 %1990  ;;  %v2016_v43 = vmul.f32 %v1998_v41, %v1896_v11 }
0x12c7   :  { %v1993_v53 = vsel %vm326_vm1, %v2622_v5, %v1991_v16 }
0x12c8   :  { %v2017_v33 = vmul.f32 %v2626_v46, %v1993_v53  ;;  %v2003_v45 = vpop.permute.xlu1 %2002 }
0x12ca   :  { %v2018_v2 = vadd.f32 %v2017_v33, %v2016_v43  ;;  %v2000_v34 = vpop.permute.xlu0 %1999 }
0x12cb   :  { %v2005_v14 = vsel %vm326_vm1, %v2000_v34, %v2003_v45 }
0x12cc   :  { %2627 = vtanh.f32 %v2018_v2 }
0x12d9   :  { %v2628_v63 = vpop.eup %2627 }
0x12da   :  { %v2020_v30 = vmul.f32 %v2628_v63, %v2005_v14 }
0x12dc   :  { %v2390_v36 = vsel %vm326_vm1, %v1898_v27, %v2020_v30  ;;  %v2391_v38 = vsel %vm326_vm1, %v2020_v30, %v1898_v27  ;;  %2460 = vmatmul.mubr.msk.f32.vlgmr.msra.gmra.mxu1 %vm78_vm0, %v2020_v30 }
0x12dd   :  { %2398 = vst.msk [vmem:[%s3684_s7 + $0x18] sm:$0xff] %vm78_vm0, %v2390_v36  ;;  %2399 = vst.msk [vmem:[%s3684_s7 + $0x20] sm:$0xff] %vm78_vm0, %v2391_v38  ;;  %2287 = vmatpush1.msra.mxu1 %v3190_v20  ;;  %2334 = vmatprep.mubr.f32.mxu1 %v2665_v3 }
0x12de   :  { %2288 = vmatprep.subr.mxu1 %v3199_v40 }
0x12df   :  { %2289 = vmatpush1.msra.mxu1 %v3210_v32 }
0x12e0   :  { %2290 = vmatprep.subr.mxu1 %v3220_v48 }
0x12e1   :  { %2291 = vmatpush1.msra.mxu1 %v3231_v50 }
0x12e2   :  { %2292 = vmatprep.subr.mxu1 %v3242_v54 }
0x12e3   :  { %2293 = vmatpush1.msra.mxu1 %v3251_v59 }
0x12e4   :  { %2294 = vmatprep.subr.mxu1 %v3261_v1 }
0x12e5   :  { %2295 = vmatpush1.msra.mxu1 %v3270_v7 }
0x12e6   :  { %2296 = vmatprep.subr.mxu1 %v3281_v9 }
0x12e7   :  { %2297 = vmatpush1.msra.mxu1 %v3290_v28 }
0x12e8   :  { %2298 = vmatprep.subr.mxu1 %v3299_v18 }
0x12e9   :  { %2299 = vmatpush1.msra.mxu1 %v3308_v26 }
0x12ea   :  { %2300 = vmatprep.subr.mxu1 %v3314_v4 }
0x12eb   :  { %2301 = vmatpush1.msra.mxu1 %v3320_v0 }
0x139c   :  { %v2092_v3 = vpop.f32.mrf.mxu1 }
0x139d   :  { %v2097_v20 = vadd.f32 %v2092_v3, %v3432_v6 }
0x139e   :  { %v2094_v40 = vpop.f32.mrf.mxu1 }
0x139f   :  { %v2461_v32 = vmul.f32 -1.442695, %v2097_v20  ;;  %v2098_v48 = vadd.f32 %v2094_v40, %v3422_v61  ;;  %2129 = vrot.lane.b32.xlu0 %v2097_v20, %s2666_s0 }
0x13a1   :  { %2629 = vpow2.f32 %v2461_v32  ;;  %v2462_v50 = vmul.f32 -1.442695, %v2098_v48  ;;  %2133 = vrot.lane.b32.xlu1 %v2098_v48, %s2667_s2 }
0x13a3   :  { %2631 = vpow2.f32 %v2462_v50 }
0x13ae   :  { %v2630_v54 = vpop.eup %2629 }
0x13af   :  { %v2105_v59 = vadd.f32 1.0, %v2630_v54 }
0x13b0   :  { %v2632_v1 = vpop.eup %2631 }
0x13b1   :  { %2633 = vrcp.f32 %v2105_v59  ;;  %v2106_v7 = vadd.f32 1.0, %v2632_v1 }
0x13b3   :  { %2635 = vrcp.f32 %v2106_v7 }
0x13be   :  { %v2634_v9 = vpop.eup %2633 }
0x13bf   :  { %2117 = vrot.lane.b32.xlu1 %v2634_v9, %s2667_s2 }
0x13c0   :  { %v2636_v28 = vpop.eup %2635 }
0x13c1   :  { %2112 = vrot.lane.b32.xlu0 %v2636_v28, %s2668_s12 }
0x13c3   :  { %2124 = vrot.lane.b32.xlu1 %v2636_v28, %s2666_s0 }
0x13c5   :  { %2121 = vrot.lane.b32.xlu0 %v2634_v9, %s2668_s12 }
0x1411   :  { %v2130_v26 = vpop.permute.xlu0 %2129 }
0x1413   :  { %v2134_v18 = vpop.permute.xlu1 %2133 }
0x1414   :  { %v2136_v4 = vsel %vm326_vm1, %v2130_v26, %v2134_v18 }
0x1415   :  { %2637 = vtanh.f32 %v2136_v4 }
0x1422   :  { %v2638_v60 = vpop.eup %2637 }
0x1431   :  { %v2118_v0 = vpop.permute.xlu1 %2117 }
0x1432   :  { %v2120_v61 = vsel %vm326_vm1, %v2118_v0, %v2636_v28 }
0x1433   :  { %v2113_v6 = vpop.permute.xlu0 %2112  ;;  %v2138_v42 = vmul.f32 %v2120_v61, %v2018_v2 }
0x1434   :  { %v2115_v8 = vsel %vm326_vm1, %v2634_v9, %v2113_v6 }
0x1435   :  { %v2139_v11 = vmul.f32 %v2638_v60, %v2115_v8  ;;  %v2125_v21 = vpop.permute.xlu1 %2124 }
0x1437   :  { %v2140_v13 = vadd.f32 %v2139_v11, %v2138_v42  ;;  %v2122_v17 = vpop.permute.xlu0 %2121 }
0x1438   :  { %v2127_v27 = vsel %vm326_vm1, %v2122_v17, %v2125_v21 }
0x1439   :  { %2639 = vtanh.f32 %v2140_v13 }
0x1446   :  { %v2640_v25 = vpop.eup %2639 }
0x1447   :  { %v2142_v37 = vmul.f32 %v2640_v25, %v2127_v27 }
0x1449   :  { %v2389_v47 = vsel %vm326_vm1, %v3514_v57, %v2142_v37  ;;  %v2392_v19 = vsel %vm326_vm1, %v2142_v37, %v3514_v57  ;;  %2463 = vmatmul.mubr.msk.f32.vlgmr.msra.gmra.mxu0 %vm78_vm0, %v2142_v37 }
0x144a   :  { %2397 = vst.msk [vmem:[%s3684_s7 + $0x10] sm:$0xff] %vm78_vm0, %v2389_v47  ;;  %2400 = vst.msk [vmem:[%s3684_s7 + $0x28] sm:$0xff] %vm78_vm0, %v2392_v19 }
0x1509   :  { %v2214_v29 = vpop.f32.mrf.mxu0 }
0x150a   :  { %v2219_v35 = vadd.f32 %v2214_v29, %v3436_v15 }
0x150b   :  { %v2216_v52 = vpop.f32.mrf.mxu0 }
0x150c   :  { %v2464_v31 = vmul.f32 -1.442695, %v2219_v35  ;;  %v2220_v49 = vadd.f32 %v2216_v52, %v3418_v55  ;;  %2251 = vrot.lane.b32.xlu0 %v2219_v35, %s2666_s0 }
0x150e   :  { %2641 = vpow2.f32 %v2464_v31  ;;  %v2465_v57 = vmul.f32 -1.442695, %v2220_v49  ;;  %2255 = vrot.lane.b32.xlu1 %v2220_v49, %s2667_s2 }
0x1510   :  { %2643 = vpow2.f32 %v2465_v57 }
0x151b   :  { %v2642_v24 = vpop.eup %2641 }
0x151c   :  { %v2227_v51 = vadd.f32 1.0, %v2642_v24 }
0x151d   :  { %v2644_v5 = vpop.eup %2643 }
0x151e   :  { %2645 = vrcp.f32 %v2227_v51  ;;  %v2228_v12 = vadd.f32 1.0, %v2644_v5 }
0x1520   :  { %2647 = vrcp.f32 %v2228_v12 }
0x152b   :  { %v2646_v58 = vpop.eup %2645 }
0x152c   :  { %2239 = vrot.lane.b32.xlu1 %v2646_v58, %s2667_s2 }
0x152d   :  { %v2648_v15 = vpop.eup %2647 }
0x152e   :  { %2234 = vrot.lane.b32.xlu0 %v2648_v15, %s2668_s12 }
0x1530   :  { %2246 = vrot.lane.b32.xlu1 %v2648_v15, %s2666_s0 }
0x1532   :  { %2243 = vrot.lane.b32.xlu0 %v2646_v58, %s2668_s12 }
0x157e   :  { %v2252_v10 = vpop.permute.xlu0 %2251 }
0x1580   :  { %v2256_v55 = vpop.permute.xlu1 %2255 }
0x1581   :  { %v2258_v62 = vsel %vm326_vm1, %v2252_v10, %v2256_v55 }
0x1582   :  { %2649 = vtanh.f32 %v2258_v62 }
0x158f   :  { %v2650_v46 = vpop.eup %2649 }
0x159e   :  { %v2240_v39 = vpop.permute.xlu1 %2239 }
0x159f   :  { %v2242_v41 = vsel %vm326_vm1, %v2240_v39, %v2648_v15 }
0x15a0   :  { %v2235_v16 = vpop.permute.xlu0 %2234  ;;  %v2260_v43 = vmul.f32 %v2242_v41, %v2140_v13 }
0x15a1   :  { %v2237_v53 = vsel %vm326_vm1, %v2646_v58, %v2235_v16 }
0x15a2   :  { %v2261_v33 = vmul.f32 %v2650_v46, %v2237_v53  ;;  %v2247_v45 = vpop.permute.xlu1 %2246 }
0x15a4   :  { %v2262_v2 = vadd.f32 %v2261_v33, %v2260_v43  ;;  %v2244_v34 = vpop.permute.xlu0 %2243 }
0x15a5   :  { %v2249_v14 = vsel %vm326_vm1, %v2244_v34, %v2247_v45 }
0x15a6   :  { %2651 = vtanh.f32 %v2262_v2 }
0x15b3   :  { %v2652_v63 = vpop.eup %2651 }
0x15b4   :  { %v2264_v30 = vmul.f32 %v2652_v63, %v2249_v14 }
0x15b6   :  { %v2388_v36 = vsel %vm326_vm1, %v3481_v44, %v2264_v30  ;;  %v2393_v38 = vsel %vm326_vm1, %v2264_v30, %v3481_v44  ;;  %2466 = vmatmul.mubr.msk.f32.vlgmr.msra.gmra.mxu1 %vm78_vm0, %v2264_v30 }
0x15b7   :  { %2396 = vst.msk [vmem:[%s3684_s7 + $0x8] sm:$0xff] %vm78_vm0, %v2388_v36  ;;  %2401 = vst.msk [vmem:[%s3684_s7 + $0x30] sm:$0xff] %vm78_vm0, %v2393_v38 }
0x1676   :  { %v2336_v3 = vpop.f32.mrf.mxu1 }
0x1677   :  { %v2341_v20 = vadd.f32 %v2336_v3, %v3438_v23 }
0x1678   :  { %v2338_v40 = vpop.f32.mrf.mxu1 }
0x1679   :  { %v2467_v32 = vmul.f32 -1.442695, %v2341_v20  ;;  %v2342_v48 = vadd.f32 %v2338_v40, %v3413_v56  ;;  %2373 = vrot.lane.b32.xlu0 %v2341_v20, %s2666_s0 }
0x167b   :  { %2653 = vpow2.f32 %v2467_v32  ;;  %v2468_v44 = vmul.f32 -1.442695, %v2342_v48  ;;  %2377 = vrot.lane.b32.xlu1 %v2342_v48, %s2667_s2 }
0x167d   :  { %2655 = vpow2.f32 %v2468_v44 }
0x1688   :  { %v2654_v50 = vpop.eup %2653 }
0x1689   :  { %v2349_v54 = vadd.f32 1.0, %v2654_v50 }
0x168a   :  { %v2656_v59 = vpop.eup %2655 }
0x168b   :  { %2657 = vrcp.f32 %v2349_v54  ;;  %v2350_v1 = vadd.f32 1.0, %v2656_v59 }
0x168d   :  { %2659 = vrcp.f32 %v2350_v1 }
0x1698   :  { %v2658_v7 = vpop.eup %2657 }
0x1699   :  { %2361 = vrot.lane.b32.xlu1 %v2658_v7, %s2667_s2 }
0x169a   :  { %v2660_v23 = vpop.eup %2659 }
0x169b   :  { %2356 = vrot.lane.b32.xlu0 %v2660_v23, %s2668_s12 }
0x169d   :  { %2368 = vrot.lane.b32.xlu1 %v2660_v23, %s2666_s0 }
0x169f   :  { %2365 = vrot.lane.b32.xlu0 %v2658_v7, %s2668_s12 }
0x16eb   :  { %v2374_v9 = vpop.permute.xlu0 %2373 }
0x16ed   :  { %v2378_v56 = vpop.permute.xlu1 %2377 }
0x16ee   :  { %v2380_v28 = vsel %vm326_vm1, %v2374_v9, %v2378_v56 }
0x16ef   :  { %2661 = vtanh.f32 %v2380_v28 }
0x16fc   :  { %v2662_v0 = vpop.eup %2661 }
0x170b   :  { %v2362_v18 = vpop.permute.xlu1 %2361 }
0x170c   :  { %v2364_v26 = vsel %vm326_vm1, %v2362_v18, %v2660_v23 }
0x170d   :  { %v2357_v4 = vpop.permute.xlu0 %2356  ;;  %v2382_v6 = vmul.f32 %v2364_v26, %v2262_v2 }
0x170e   :  { %v2359_v61 = vsel %vm326_vm1, %v2658_v7, %v2357_v4 }
0x170f   :  { %v2383_v60 = vmul.f32 %v2662_v0, %v2359_v61  ;;  %v2369_v11 = vpop.permute.xlu1 %2368 }
0x1711   :  { %v2384_v8 = vadd.f32 %v2383_v60, %v2382_v6  ;;  %v2366_v42 = vpop.permute.xlu0 %2365 }
0x1712   :  { %v2371_v17 = vsel %vm326_vm1, %v2366_v42, %v2369_v11 }
0x1713   :  { %2663 = vtanh.f32 %v2384_v8 }
0x1720   :  { %v2664_v13 = vpop.eup %2663 }
0x1721   :  { %v2386_v21 = vmul.f32 %v2664_v13, %v2371_v17 }
0x1723   :  { %v2387_v25 = vsel %vm326_vm1, %v3449_v22, %v2386_v21  ;;  %v2394_v27 = vsel %vm326_vm1, %v2386_v21, %v3449_v22 }
0x1724   :  { %2395 = vst.msk [vmem:[%s3684_s7] sm:$0xff] %vm78_vm0, %v2387_v25  ;;  %2402 = vst.msk [vmem:[%s3684_s7 + $0x38] sm:$0xff] %vm78_vm0, %v2394_v27 }

</bundles_post_ra>
